<compile_context>
chip_gen: v5e
topology: v5e:2x2
jax: 0.10.0
libtpu: 0.0.40
codegen_flags: <defaults>
</compile_context>

<pallas_src>
import functools

import numpy as np

import jax
import jax.numpy as jnp
from jax.experimental import pallas as pl
from jax.experimental.pallas import tpu as pltpu

_BN_EPS = 1e-5


# ----------------------------------------------------------------------------
# Fused Pallas kernel: everything in (C, M) layout, M = N*Ho*Wo on lanes.
# ----------------------------------------------------------------------------
def _fused_upblock_kernel(xc_ref, g_ref, masks_ref,
                          w_up_ref, b_up_ref,
                          w_ag_ref, gam_ag_ref, bet_ag_ref,
                          w_ax_ref, gam_ax_ref, bet_ax_ref,
                          w_psi_ref, gam_psi_ref, bet_psi_ref,
                          w_fa_ref, w_fd_ref, b_fire_ref, gam_f_ref, bet_f_ref,
                          w_left_ref, b_left_ref,
                          w_right_ref, b_right_ref,
                          out_ref, *, W):
    M = g_ref.shape[1]
    inv_m = 1.0 / M

    def bn(t, gam, bet):
        # training-mode batch stats over the batch/spatial axis (lanes),
        # centred two-pass variance (biased, like PyTorch normalization).
        mean = jnp.sum(t, axis=1, keepdims=True) * inv_m
        c = t - mean
        var = jnp.sum(c * c, axis=1, keepdims=True) * inv_m
        return c * jax.lax.rsqrt(var + _BN_EPS) * gam + bet

    # --- ConvTranspose2d: one (Cf, K*K*Cin) x (K*K*Cin, M) matmul on the
    #     pre-built transposed im2col, f32 MXU accumulation, plus bias.
    d = jnp.dot(w_up_ref[...], xc_ref[...],
                preferred_element_type=jnp.float32) + b_up_ref[...]   # (Cf, M)

    g = g_ref[...]                                                    # (Cg, M)

    # --- AttentionBlock (1x1 convs == small matmuls, channels on sublanes)
    g1 = bn(jnp.dot(w_ag_ref[...], d, preferred_element_type=jnp.float32),
            gam_ag_ref[...], bet_ag_ref[...])                         # (Ca, M)
    x1 = bn(jnp.dot(w_ax_ref[...], g, preferred_element_type=jnp.float32),
            gam_ax_ref[...], bet_ax_ref[...])                         # (Ca, M)
    a = jnp.maximum(g1 + x1, 0.0)
    # psi conv has one output channel -> sublane reduction (XLU), no matmul
    psi = jnp.sum(a * w_psi_ref[...], axis=0, keepdims=True)          # (1, M)
    psi = jax.nn.sigmoid(bn(psi, gam_psi_ref[...], bet_psi_ref[...]))
    att = g * psi                                                     # (Cg, M)

    # --- FireModule squeeze: concat([att, d]) folded into split weights
    f = (jnp.dot(w_fa_ref[...], att, preferred_element_type=jnp.float32)
         + jnp.dot(w_fd_ref[...], d, preferred_element_type=jnp.float32)
         + b_fire_ref[...])                                           # (sq, M)
    f = bn(jnp.maximum(f, 0.0), gam_f_ref[...], bet_f_ref[...])       # ReLU->BN

    # --- left 1x1 + ReLU
    left = jnp.maximum(
        jnp.dot(w_left_ref[...], f, preferred_element_type=jnp.float32)
        + b_left_ref[...], 0.0)                                       # (ex, M)

    # --- right 3x3 conv (padding=1): 9 lane rotations of f (pltpu.roll, XLU)
    #     masked with precomputed zero-padding masks, each contracted with
    #     its (ex, sq) weight slice on the MXU and accumulated in f32.
    r_acc = None
    t = 0
    for dh in (-1, 0, 1):
        for dw in (-1, 0, 1):
            off = dh * W + dw                       # static lane offset
            if off == 0:
                tap = f
            else:
                # tap[:, m] = f[:, m + off] (zero outside the image border)
                tap = pltpu.roll(f, (-off) % M, 1) * masks_ref[t]
            contrib = jnp.dot(w_right_ref[t], tap,
                              preferred_element_type=jnp.float32)
            r_acc = contrib if r_acc is None else r_acc + contrib
            t += 1
    right = jnp.maximum(r_acc + b_right_ref[...], 0.0)                # (ex, M)

    # --- cat([left, right], channel) -> lane-dense, sublane-aligned stores
    ex = left.shape[0]
    out_ref[0:ex, :] = left
    out_ref[ex:, :] = right


def _fused_call(xc, g_cm, masks, p, *, W, out_ch):
    M = xc.shape[1]
    args = (xc, g_cm, masks,
            p["w_up"], p["b_up"],
            p["w_att_g"], p["gamma_att_g"], p["beta_att_g"],
            p["w_att_x"], p["gamma_att_x"], p["beta_att_x"],
            p["w_att_psi"], p["gamma_att_psi"], p["beta_att_psi"],
            p["w_fire_att"], p["w_fire_d"], p["b_fire"],
            p["gamma_fire"], p["beta_fire"],
            p["w_left"], p["b_left"],
            p["w_right"], p["b_right"])
    kern = functools.partial(_fused_upblock_kernel, W=W)
    vmem = pl.BlockSpec(memory_space=pltpu.MemorySpace.VMEM)
    return pl.pallas_call(
        kern,
        out_shape=jax.ShapeDtypeStruct((out_ch, M), jnp.float32),
        in_specs=[vmem] * len(args),
        out_specs=vmem,
    )(*args)


# ----------------------------------------------------------------------------
# Wrapper: NCHW in/out; builds the deconv's transposed im2col + tap masks.
# ----------------------------------------------------------------------------
def upsampling_block_forward(x_nchw, g_nchw, params, cfg):
    x = x_nchw.astype(jnp.float32)
    g = g_nchw.astype(jnp.float32)
    N, Cx, Hx, Wx = x.shape
    _, Cg, Hg, Wg = g.shape
    sh, sw = cfg["strides"]
    K = cfg["deconv_ksize"]
    op = 0 if sh == 1 else 1
    ex = cfg["expand"]

    # ConvTranspose2d == dilate-by-stride + pad (K-1-padding, +output_padding)
    # + stride-1 conv with spatially flipped weights (flip folded into w_up).
    Hd, Wd = (Hx - 1) * sh + 1, (Wx - 1) * sw + 1
    xd = jnp.zeros((N, Cx, Hd, Wd), jnp.float32).at[:, :, ::sh, ::sw].set(x)
    pt, pb = K - 2, K - 2 + op                       # module hardcodes padding=1
    xp = jnp.pad(xd, ((0, 0), (0, 0), (pt, pb), (pt, pb)))
    Ho, Wo = Hd + pt + pb - K + 1, Wd + pt + pb - K + 1
    assert (Hg, Wg) == (Ho, Wo), (Hg, Wg, Ho, Wo)
    M = N * Ho * Wo

    # transposed im2col: rows index (kh, kw, cin), cols index m = (n, oh, ow)
    cols = []
    for kh in range(K):
        for kw in range(K):
            win = xp[:, :, kh:kh + Ho, kw:kw + Wo]                  # (N,Cx,Ho,Wo)
            cols.append(jnp.transpose(win, (1, 0, 2, 3)).reshape(Cx, M))
    xc = jnp.concatenate(cols, axis=0)                              # (K*K*Cx, M)

    g_cm = jnp.transpose(g, (1, 0, 2, 3)).reshape(Cg, M)            # (Cg, M)

    # zero-padding masks for the 3x3 "same" conv taps; constant at trace time.
    hh = np.tile(np.repeat(np.arange(Ho), Wo), N)                   # (M,)
    ww = np.tile(np.tile(np.arange(Wo), Ho), N)                     # (M,)
    masks = np.stack([((hh + dh >= 0) & (hh + dh < Ho) &
                       (ww + dw >= 0) & (ww + dw < Wo)).astype(np.float32)
                      for dh in (-1, 0, 1) for dw in (-1, 0, 1)], axis=0)
    masks = jnp.asarray(masks.reshape(9, 1, M))                     # (9, 1, M)

    out_cm = _fused_call(xc, g_cm, masks, params, W=Wo, out_ch=2 * ex)

    out = out_cm.reshape(2 * ex, N, Ho, Wo)
    return jnp.transpose(out, (1, 0, 2, 3))                         # NCHW


# ----------------------------------------------------------------------------
# Deterministic parameter init (PyTorch layouts -> kernel layouts)
# ----------------------------------------------------------------------------
def init_params(key, cfg):
    in_x, in_g = cfg["in_channels_x"], cfg["in_channels_g"]
    filt, att_f = cfg["filters"], cfg["att_filters"]
    sq, ex = cfg["squeeze"], cfg["expand"]
    K = cfg["deconv_ksize"]
    ks = jax.random.split(key, 20)

    def nrm(k, shape, scale=0.1):
        return scale * jax.random.normal(k, shape, jnp.float32)

    p = {}
    # ConvTranspose2d weight (Cin, Cout, K, K) -> flipped, flattened to
    # (Cout, K*K*Cin) with column index (kh*K + kw)*Cin + cin.
    w_t = nrm(ks[0], (in_x, filt, K, K))
    w_flip = w_t[:, :, ::-1, ::-1]
    p["w_up"] = jnp.transpose(w_flip, (1, 2, 3, 0)).reshape(filt, K * K * in_x)
    p["b_up"] = nrm(ks[1], (filt, 1))

    # AttentionBlock 1x1 convs (bias=False): (Cout, Cin, 1, 1) -> (Cout, Cin)
    p["w_att_g"] = nrm(ks[2], (att_f, filt, 1, 1)).reshape(att_f, filt)
    p["w_att_x"] = nrm(ks[3], (att_f, in_g, 1, 1)).reshape(att_f, in_g)
    p["w_att_psi"] = nrm(ks[4], (1, att_f, 1, 1)).reshape(1, att_f).T   # (Ca, 1)
    for name, c, ki in (("att_g", att_f, 5), ("att_x", att_f, 6), ("att_psi", 1, 7)):
        p[f"gamma_{name}"] = 1.0 + nrm(ks[ki], (c, 1))
        p[f"beta_{name}"] = nrm(ks[ki + 3], (c, 1))

    # FireModule squeeze conv (sq, in_g + filt, 1, 1): split into the part
    # acting on the attention output (first in_g channels of the torch concat)
    # and the part acting on d (last `filt` channels) -> no concat needed.
    w_fire = nrm(ks[11], (sq, in_g + filt, 1, 1)).reshape(sq, in_g + filt)
    p["w_fire_att"] = w_fire[:, :in_g]
    p["w_fire_d"] = w_fire[:, in_g:]
    p["b_fire"] = nrm(ks[12], (sq, 1))
    p["gamma_fire"] = 1.0 + nrm(ks[13], (sq, 1))
    p["beta_fire"] = nrm(ks[14], (sq, 1))

    p["w_left"] = nrm(ks[15], (ex, sq, 1, 1)).reshape(ex, sq)
    p["b_left"] = nrm(ks[16], (ex, 1))
    # right 3x3 conv (ex, sq, 3, 3) -> (9, ex, sq), tap index t = kh*3 + kw
    w_r = nrm(ks[17], (ex, sq, 3, 3))
    p["w_right"] = jnp.transpose(w_r, (2, 3, 0, 1)).reshape(9, ex, sq)
    p["b_right"] = nrm(ks[18], (ex, 1))
    return p


# ----------------------------------------------------------------------------
if __name__ == "__main__":
    cfg = dict(in_channels_x=8, in_channels_g=6, filters=8, fire_id=1,
               squeeze=4, expand=8, strides=(2, 2), deconv_ksize=3,
               att_filters=4)

    key = jax.random.PRNGKey(0)
    kx, kg, kp = jax.random.split(key, 3)
    # PyTorch NCHW inputs: x is the decoder feature (8x8), g the skip (16x16)
    x = jax.random.normal(kx, (2, cfg["in_channels_x"], 8, 8), jnp.float32)
    g = jax.random.normal(kg, (2, cfg["in_channels_g"], 16, 16), jnp.float32)
    params = init_params(kp, cfg)

    fwd = jax.jit(lambda a, b, p: upsampling_block_forward(a, b, p, cfg))
    out = jax.block_until_ready(fwd(x, g, params))

    assert out.shape == (2, 2 * cfg["expand"], 16, 16), out.shape
    assert bool(jnp.all(jnp.isfinite(out)))
    print("KERNEL_OK")
</pallas_src>

<mosaic_0001>
module attributes {stable_mosaic.version = 11 : i64} {
  func.func @_fused_upblock_kernel(%arg0: memref<72x512xf32, #tpu.memory_space<vmem>>, %arg1: memref<6x512xf32, #tpu.memory_space<vmem>>, %arg2: memref<9x1x512xf32, #tpu.memory_space<vmem>>, %arg3: memref<8x72xf32, #tpu.memory_space<vmem>>, %arg4: memref<8x1xf32, #tpu.memory_space<vmem>>, %arg5: memref<4x8xf32, #tpu.memory_space<vmem>>, %arg6: memref<4x1xf32, #tpu.memory_space<vmem>>, %arg7: memref<4x1xf32, #tpu.memory_space<vmem>>, %arg8: memref<4x6xf32, #tpu.memory_space<vmem>>, %arg9: memref<4x1xf32, #tpu.memory_space<vmem>>, %arg10: memref<4x1xf32, #tpu.memory_space<vmem>>, %arg11: memref<4x1xf32, #tpu.memory_space<vmem>>, %arg12: memref<1x1xf32, #tpu.memory_space<vmem>>, %arg13: memref<1x1xf32, #tpu.memory_space<vmem>>, %arg14: memref<4x6xf32, #tpu.memory_space<vmem>>, %arg15: memref<4x8xf32, #tpu.memory_space<vmem>>, %arg16: memref<4x1xf32, #tpu.memory_space<vmem>>, %arg17: memref<4x1xf32, #tpu.memory_space<vmem>>, %arg18: memref<4x1xf32, #tpu.memory_space<vmem>>, %arg19: memref<8x4xf32, #tpu.memory_space<vmem>>, %arg20: memref<8x1xf32, #tpu.memory_space<vmem>>, %arg21: memref<9x8x4xf32, #tpu.memory_space<vmem>>, %arg22: memref<8x1xf32, #tpu.memory_space<vmem>>, %arg23: memref<16x512xf32, #tpu.memory_space<vmem>>) attributes {dimension_semantics = [], scalar_prefetch = 0 : i64, scratch_operands = 0 : i64, tpu.core_type = #tpu.core_type<tc>} {
    %c0 = arith.constant 0 : index
    %c0_0 = arith.constant 0 : index
    %0 = vector.load %arg3[%c0, %c0_0] : memref<8x72xf32, #tpu.memory_space<vmem>>, vector<8x72xf32>
    %c0_1 = arith.constant 0 : index
    %c0_2 = arith.constant 0 : index
    %1 = vector.load %arg0[%c0_1, %c0_2] : memref<72x512xf32, #tpu.memory_space<vmem>>, vector<72x512xf32>
    %cst = arith.constant dense<0.000000e+00> : vector<8x512xf32>
    %2 = tpu.matmul %0, %1, %cst {dimension_numbers = #tpu.dot_dimension_numbers<[1], [0], [0], [1], [0, 0, 1, 1], [], []>} : vector<8x72xf32>, vector<72x512xf32>, vector<8x512xf32> -> vector<8x512xf32>
    %c0_3 = arith.constant 0 : index
    %c0_4 = arith.constant 0 : index
    %3 = vector.load %arg4[%c0_3, %c0_4] : memref<8x1xf32, #tpu.memory_space<vmem>>, vector<8x1xf32>
    %4 = vector.broadcast %3 : vector<8x1xf32> to vector<8x512xf32>
    %5 = arith.addf %2, %4 : vector<8x512xf32>
    %c0_5 = arith.constant 0 : index
    %c0_6 = arith.constant 0 : index
    %6 = vector.load %arg1[%c0_5, %c0_6] : memref<6x512xf32, #tpu.memory_space<vmem>>, vector<6x512xf32>
    %c0_7 = arith.constant 0 : index
    %c0_8 = arith.constant 0 : index
    %7 = vector.load %arg5[%c0_7, %c0_8] : memref<4x8xf32, #tpu.memory_space<vmem>>, vector<4x8xf32>
    %cst_9 = arith.constant dense<0.000000e+00> : vector<4x512xf32>
    %8 = tpu.matmul %7, %5, %cst_9 {dimension_numbers = #tpu.dot_dimension_numbers<[1], [0], [0], [1], [0, 0, 1, 1], [], []>} : vector<4x8xf32>, vector<8x512xf32>, vector<4x512xf32> -> vector<4x512xf32>
    %c0_10 = arith.constant 0 : index
    %c0_11 = arith.constant 0 : index
    %9 = vector.load %arg6[%c0_10, %c0_11] : memref<4x1xf32, #tpu.memory_space<vmem>>, vector<4x1xf32>
    %c0_12 = arith.constant 0 : index
    %c0_13 = arith.constant 0 : index
    %10 = vector.load %arg7[%c0_12, %c0_13] : memref<4x1xf32, #tpu.memory_space<vmem>>, vector<4x1xf32>
    %cst_14 = arith.constant dense<0.000000e+00> : vector<4xf32>
    %11 = vector.multi_reduction <add>, %8, %cst_14 [1] : vector<4x512xf32> to vector<4xf32>
    %12 = vector.shape_cast %11 : vector<4xf32> to vector<4x1xf32>
    %cst_15 = arith.constant 0.001953125 : f32
    %13 = vector.broadcast %cst_15 : f32 to vector<4x1xf32>
    %14 = arith.mulf %12, %13 : vector<4x1xf32>
    %15 = vector.broadcast %14 : vector<4x1xf32> to vector<4x512xf32>
    %16 = arith.subf %8, %15 : vector<4x512xf32>
    %17 = arith.mulf %16, %16 : vector<4x512xf32>
    %cst_16 = arith.constant dense<0.000000e+00> : vector<4xf32>
    %18 = vector.multi_reduction <add>, %17, %cst_16 [1] : vector<4x512xf32> to vector<4xf32>
    %19 = vector.shape_cast %18 : vector<4xf32> to vector<4x1xf32>
    %cst_17 = arith.constant 0.001953125 : f32
    %20 = vector.broadcast %cst_17 : f32 to vector<4x1xf32>
    %21 = arith.mulf %19, %20 : vector<4x1xf32>
    %cst_18 = arith.constant 9.99999974E-6 : f32
    %22 = vector.broadcast %cst_18 : f32 to vector<4x1xf32>
    %23 = arith.addf %21, %22 : vector<4x1xf32>
    %24 = math.rsqrt %23 : vector<4x1xf32>
    %25 = vector.broadcast %24 : vector<4x1xf32> to vector<4x512xf32>
    %26 = arith.mulf %16, %25 : vector<4x512xf32>
    %27 = vector.broadcast %9 : vector<4x1xf32> to vector<4x512xf32>
    %28 = arith.mulf %26, %27 : vector<4x512xf32>
    %29 = vector.broadcast %10 : vector<4x1xf32> to vector<4x512xf32>
    %30 = arith.addf %28, %29 : vector<4x512xf32>
    %c0_19 = arith.constant 0 : index
    %c0_20 = arith.constant 0 : index
    %31 = vector.load %arg8[%c0_19, %c0_20] : memref<4x6xf32, #tpu.memory_space<vmem>>, vector<4x6xf32>
    %cst_21 = arith.constant dense<0.000000e+00> : vector<4x512xf32>
    %32 = tpu.matmul %31, %6, %cst_21 {dimension_numbers = #tpu.dot_dimension_numbers<[1], [0], [0], [1], [0, 0, 1, 1], [], []>} : vector<4x6xf32>, vector<6x512xf32>, vector<4x512xf32> -> vector<4x512xf32>
    %c0_22 = arith.constant 0 : index
    %c0_23 = arith.constant 0 : index
    %33 = vector.load %arg9[%c0_22, %c0_23] : memref<4x1xf32, #tpu.memory_space<vmem>>, vector<4x1xf32>
    %c0_24 = arith.constant 0 : index
    %c0_25 = arith.constant 0 : index
    %34 = vector.load %arg10[%c0_24, %c0_25] : memref<4x1xf32, #tpu.memory_space<vmem>>, vector<4x1xf32>
    %cst_26 = arith.constant dense<0.000000e+00> : vector<4xf32>
    %35 = vector.multi_reduction <add>, %32, %cst_26 [1] : vector<4x512xf32> to vector<4xf32>
    %36 = vector.shape_cast %35 : vector<4xf32> to vector<4x1xf32>
    %cst_27 = arith.constant 0.001953125 : f32
    %37 = vector.broadcast %cst_27 : f32 to vector<4x1xf32>
    %38 = arith.mulf %36, %37 : vector<4x1xf32>
    %39 = vector.broadcast %38 : vector<4x1xf32> to vector<4x512xf32>
    %40 = arith.subf %32, %39 : vector<4x512xf32>
    %41 = arith.mulf %40, %40 : vector<4x512xf32>
    %cst_28 = arith.constant dense<0.000000e+00> : vector<4xf32>
    %42 = vector.multi_reduction <add>, %41, %cst_28 [1] : vector<4x512xf32> to vector<4xf32>
    %43 = vector.shape_cast %42 : vector<4xf32> to vector<4x1xf32>
    %cst_29 = arith.constant 0.001953125 : f32
    %44 = vector.broadcast %cst_29 : f32 to vector<4x1xf32>
    %45 = arith.mulf %43, %44 : vector<4x1xf32>
    %cst_30 = arith.constant 9.99999974E-6 : f32
    %46 = vector.broadcast %cst_30 : f32 to vector<4x1xf32>
    %47 = arith.addf %45, %46 : vector<4x1xf32>
    %48 = math.rsqrt %47 : vector<4x1xf32>
    %49 = vector.broadcast %48 : vector<4x1xf32> to vector<4x512xf32>
    %50 = arith.mulf %40, %49 : vector<4x512xf32>
    %51 = vector.broadcast %33 : vector<4x1xf32> to vector<4x512xf32>
    %52 = arith.mulf %50, %51 : vector<4x512xf32>
    %53 = vector.broadcast %34 : vector<4x1xf32> to vector<4x512xf32>
    %54 = arith.addf %52, %53 : vector<4x512xf32>
    %55 = arith.addf %30, %54 : vector<4x512xf32>
    %cst_31 = arith.constant 0.000000e+00 : f32
    %56 = vector.broadcast %cst_31 : f32 to vector<4x512xf32>
    %57 = arith.maximumf %55, %56 : vector<4x512xf32>
    %c0_32 = arith.constant 0 : index
    %c0_33 = arith.constant 0 : index
    %58 = vector.load %arg11[%c0_32, %c0_33] : memref<4x1xf32, #tpu.memory_space<vmem>>, vector<4x1xf32>
    %59 = vector.broadcast %58 : vector<4x1xf32> to vector<4x512xf32>
    %60 = arith.mulf %57, %59 : vector<4x512xf32>
    %cst_34 = arith.constant dense<0.000000e+00> : vector<512xf32>
    %61 = vector.multi_reduction <add>, %60, %cst_34 [0] : vector<4x512xf32> to vector<512xf32>
    %62 = vector.shape_cast %61 : vector<512xf32> to vector<1x512xf32>
    %c0_35 = arith.constant 0 : index
    %c0_36 = arith.constant 0 : index
    %63 = vector.load %arg12[%c0_35, %c0_36] : memref<1x1xf32, #tpu.memory_space<vmem>>, vector<1x1xf32>
    %c0_37 = arith.constant 0 : index
    %c0_38 = arith.constant 0 : index
    %64 = vector.load %arg13[%c0_37, %c0_38] : memref<1x1xf32, #tpu.memory_space<vmem>>, vector<1x1xf32>
    %cst_39 = arith.constant dense<0.000000e+00> : vector<1xf32>
    %65 = vector.multi_reduction <add>, %62, %cst_39 [1] : vector<1x512xf32> to vector<1xf32>
    %66 = vector.shape_cast %65 : vector<1xf32> to vector<1x1xf32>
    %cst_40 = arith.constant 0.001953125 : f32
    %67 = vector.broadcast %cst_40 : f32 to vector<1x1xf32>
    %68 = arith.mulf %66, %67 : vector<1x1xf32>
    %69 = vector.broadcast %68 : vector<1x1xf32> to vector<1x512xf32>
    %70 = arith.subf %62, %69 : vector<1x512xf32>
    %71 = arith.mulf %70, %70 : vector<1x512xf32>
    %cst_41 = arith.constant dense<0.000000e+00> : vector<1xf32>
    %72 = vector.multi_reduction <add>, %71, %cst_41 [1] : vector<1x512xf32> to vector<1xf32>
    %73 = vector.shape_cast %72 : vector<1xf32> to vector<1x1xf32>
    %cst_42 = arith.constant 0.001953125 : f32
    %74 = vector.broadcast %cst_42 : f32 to vector<1x1xf32>
    %75 = arith.mulf %73, %74 : vector<1x1xf32>
    %cst_43 = arith.constant 9.99999974E-6 : f32
    %76 = vector.broadcast %cst_43 : f32 to vector<1x1xf32>
    %77 = arith.addf %75, %76 : vector<1x1xf32>
    %78 = math.rsqrt %77 : vector<1x1xf32>
    %79 = vector.broadcast %78 : vector<1x1xf32> to vector<1x512xf32>
    %80 = arith.mulf %70, %79 : vector<1x512xf32>
    %81 = vector.broadcast %63 : vector<1x1xf32> to vector<1x512xf32>
    %82 = arith.mulf %80, %81 : vector<1x512xf32>
    %83 = vector.broadcast %64 : vector<1x1xf32> to vector<1x512xf32>
    %84 = arith.addf %82, %83 : vector<1x512xf32>
    %85 = arith.negf %84 : vector<1x512xf32>
    %86 = math.exp %85 : vector<1x512xf32>
    %cst_44 = arith.constant 1.000000e+00 : f32
    %87 = vector.broadcast %cst_44 : f32 to vector<1x512xf32>
    %88 = arith.addf %87, %86 : vector<1x512xf32>
    %89 = arith.divf %87, %88 : vector<1x512xf32>
    %90 = vector.broadcast %89 : vector<1x512xf32> to vector<6x512xf32>
    %91 = arith.mulf %6, %90 : vector<6x512xf32>
    %c0_45 = arith.constant 0 : index
    %c0_46 = arith.constant 0 : index
    %92 = vector.load %arg14[%c0_45, %c0_46] : memref<4x6xf32, #tpu.memory_space<vmem>>, vector<4x6xf32>
    %cst_47 = arith.constant dense<0.000000e+00> : vector<4x512xf32>
    %93 = tpu.matmul %92, %91, %cst_47 {dimension_numbers = #tpu.dot_dimension_numbers<[1], [0], [0], [1], [0, 0, 1, 1], [], []>} : vector<4x6xf32>, vector<6x512xf32>, vector<4x512xf32> -> vector<4x512xf32>
    %c0_48 = arith.constant 0 : index
    %c0_49 = arith.constant 0 : index
    %94 = vector.load %arg15[%c0_48, %c0_49] : memref<4x8xf32, #tpu.memory_space<vmem>>, vector<4x8xf32>
    %cst_50 = arith.constant dense<0.000000e+00> : vector<4x512xf32>
    %95 = tpu.matmul %94, %5, %cst_50 {dimension_numbers = #tpu.dot_dimension_numbers<[1], [0], [0], [1], [0, 0, 1, 1], [], []>} : vector<4x8xf32>, vector<8x512xf32>, vector<4x512xf32> -> vector<4x512xf32>
    %96 = arith.addf %93, %95 : vector<4x512xf32>
    %c0_51 = arith.constant 0 : index
    %c0_52 = arith.constant 0 : index
    %97 = vector.load %arg16[%c0_51, %c0_52] : memref<4x1xf32, #tpu.memory_space<vmem>>, vector<4x1xf32>
    %98 = vector.broadcast %97 : vector<4x1xf32> to vector<4x512xf32>
    %99 = arith.addf %96, %98 : vector<4x512xf32>
    %cst_53 = arith.constant 0.000000e+00 : f32
    %100 = vector.broadcast %cst_53 : f32 to vector<4x512xf32>
    %101 = arith.maximumf %99, %100 : vector<4x512xf32>
    %c0_54 = arith.constant 0 : index
    %c0_55 = arith.constant 0 : index
    %102 = vector.load %arg17[%c0_54, %c0_55] : memref<4x1xf32, #tpu.memory_space<vmem>>, vector<4x1xf32>
    %c0_56 = arith.constant 0 : index
    %c0_57 = arith.constant 0 : index
    %103 = vector.load %arg18[%c0_56, %c0_57] : memref<4x1xf32, #tpu.memory_space<vmem>>, vector<4x1xf32>
    %cst_58 = arith.constant dense<0.000000e+00> : vector<4xf32>
    %104 = vector.multi_reduction <add>, %101, %cst_58 [1] : vector<4x512xf32> to vector<4xf32>
    %105 = vector.shape_cast %104 : vector<4xf32> to vector<4x1xf32>
    %cst_59 = arith.constant 0.001953125 : f32
    %106 = vector.broadcast %cst_59 : f32 to vector<4x1xf32>
    %107 = arith.mulf %105, %106 : vector<4x1xf32>
    %108 = vector.broadcast %107 : vector<4x1xf32> to vector<4x512xf32>
    %109 = arith.subf %101, %108 : vector<4x512xf32>
    %110 = arith.mulf %109, %109 : vector<4x512xf32>
    %cst_60 = arith.constant dense<0.000000e+00> : vector<4xf32>
    %111 = vector.multi_reduction <add>, %110, %cst_60 [1] : vector<4x512xf32> to vector<4xf32>
    %112 = vector.shape_cast %111 : vector<4xf32> to vector<4x1xf32>
    %cst_61 = arith.constant 0.001953125 : f32
    %113 = vector.broadcast %cst_61 : f32 to vector<4x1xf32>
    %114 = arith.mulf %112, %113 : vector<4x1xf32>
    %cst_62 = arith.constant 9.99999974E-6 : f32
    %115 = vector.broadcast %cst_62 : f32 to vector<4x1xf32>
    %116 = arith.addf %114, %115 : vector<4x1xf32>
    %117 = math.rsqrt %116 : vector<4x1xf32>
    %118 = vector.broadcast %117 : vector<4x1xf32> to vector<4x512xf32>
    %119 = arith.mulf %109, %118 : vector<4x512xf32>
    %120 = vector.broadcast %102 : vector<4x1xf32> to vector<4x512xf32>
    %121 = arith.mulf %119, %120 : vector<4x512xf32>
    %122 = vector.broadcast %103 : vector<4x1xf32> to vector<4x512xf32>
    %123 = arith.addf %121, %122 : vector<4x512xf32>
    %c0_63 = arith.constant 0 : index
    %c0_64 = arith.constant 0 : index
    %124 = vector.load %arg19[%c0_63, %c0_64] : memref<8x4xf32, #tpu.memory_space<vmem>>, vector<8x4xf32>
    %cst_65 = arith.constant dense<0.000000e+00> : vector<8x512xf32>
    %125 = tpu.matmul %124, %123, %cst_65 {dimension_numbers = #tpu.dot_dimension_numbers<[1], [0], [0], [1], [0, 0, 1, 1], [], []>} : vector<8x4xf32>, vector<4x512xf32>, vector<8x512xf32> -> vector<8x512xf32>
    %c0_66 = arith.constant 0 : index
    %c0_67 = arith.constant 0 : index
    %126 = vector.load %arg20[%c0_66, %c0_67] : memref<8x1xf32, #tpu.memory_space<vmem>>, vector<8x1xf32>
    %127 = vector.broadcast %126 : vector<8x1xf32> to vector<8x512xf32>
    %128 = arith.addf %125, %127 : vector<8x512xf32>
    %cst_68 = arith.constant 0.000000e+00 : f32
    %129 = vector.broadcast %cst_68 : f32 to vector<8x512xf32>
    %130 = arith.maximumf %128, %129 : vector<8x512xf32>
    %c17_i32 = arith.constant 17 : i32
    %131 = tpu.dynamic_rotate %123 by %c17_i32 dim 1 : vector<4x512xf32>, i32 -> vector<4x512xf32>
    %c0_69 = arith.constant 0 : index
    %c0_70 = arith.constant 0 : index
    %c0_71 = arith.constant 0 : index
    %132 = vector.load %arg2[%c0_69, %c0_70, %c0_71] : memref<9x1x512xf32, #tpu.memory_space<vmem>>, vector<1x1x512xf32>
    %133 = vector.shape_cast %132 : vector<1x1x512xf32> to vector<1x512xf32>
    %134 = vector.broadcast %133 : vector<1x512xf32> to vector<4x512xf32>
    %135 = arith.mulf %131, %134 : vector<4x512xf32>
    %c0_72 = arith.constant 0 : index
    %c0_73 = arith.constant 0 : index
    %c0_74 = arith.constant 0 : index
    %136 = vector.load %arg21[%c0_72, %c0_73, %c0_74] : memref<9x8x4xf32, #tpu.memory_space<vmem>>, vector<1x8x4xf32>
    %137 = vector.shape_cast %136 : vector<1x8x4xf32> to vector<8x4xf32>
    %cst_75 = arith.constant dense<0.000000e+00> : vector<8x512xf32>
    %138 = tpu.matmul %137, %135, %cst_75 {dimension_numbers = #tpu.dot_dimension_numbers<[1], [0], [0], [1], [0, 0, 1, 1], [], []>} : vector<8x4xf32>, vector<4x512xf32>, vector<8x512xf32> -> vector<8x512xf32>
    %c16_i32 = arith.constant 16 : i32
    %139 = tpu.dynamic_rotate %123 by %c16_i32 dim 1 : vector<4x512xf32>, i32 -> vector<4x512xf32>
    %c1 = arith.constant 1 : index
    %c0_76 = arith.constant 0 : index
    %c0_77 = arith.constant 0 : index
    %140 = vector.load %arg2[%c1, %c0_76, %c0_77] : memref<9x1x512xf32, #tpu.memory_space<vmem>>, vector<1x1x512xf32>
    %141 = vector.shape_cast %140 : vector<1x1x512xf32> to vector<1x512xf32>
    %142 = vector.broadcast %141 : vector<1x512xf32> to vector<4x512xf32>
    %143 = arith.mulf %139, %142 : vector<4x512xf32>
    %c1_78 = arith.constant 1 : index
    %c0_79 = arith.constant 0 : index
    %c0_80 = arith.constant 0 : index
    %144 = vector.load %arg21[%c1_78, %c0_79, %c0_80] : memref<9x8x4xf32, #tpu.memory_space<vmem>>, vector<1x8x4xf32>
    %145 = vector.shape_cast %144 : vector<1x8x4xf32> to vector<8x4xf32>
    %cst_81 = arith.constant dense<0.000000e+00> : vector<8x512xf32>
    %146 = tpu.matmul %145, %143, %cst_81 {dimension_numbers = #tpu.dot_dimension_numbers<[1], [0], [0], [1], [0, 0, 1, 1], [], []>} : vector<8x4xf32>, vector<4x512xf32>, vector<8x512xf32> -> vector<8x512xf32>
    %147 = arith.addf %138, %146 : vector<8x512xf32>
    %c15_i32 = arith.constant 15 : i32
    %148 = tpu.dynamic_rotate %123 by %c15_i32 dim 1 : vector<4x512xf32>, i32 -> vector<4x512xf32>
    %c2 = arith.constant 2 : index
    %c0_82 = arith.constant 0 : index
    %c0_83 = arith.constant 0 : index
    %149 = vector.load %arg2[%c2, %c0_82, %c0_83] : memref<9x1x512xf32, #tpu.memory_space<vmem>>, vector<1x1x512xf32>
    %150 = vector.shape_cast %149 : vector<1x1x512xf32> to vector<1x512xf32>
    %151 = vector.broadcast %150 : vector<1x512xf32> to vector<4x512xf32>
    %152 = arith.mulf %148, %151 : vector<4x512xf32>
    %c2_84 = arith.constant 2 : index
    %c0_85 = arith.constant 0 : index
    %c0_86 = arith.constant 0 : index
    %153 = vector.load %arg21[%c2_84, %c0_85, %c0_86] : memref<9x8x4xf32, #tpu.memory_space<vmem>>, vector<1x8x4xf32>
    %154 = vector.shape_cast %153 : vector<1x8x4xf32> to vector<8x4xf32>
    %cst_87 = arith.constant dense<0.000000e+00> : vector<8x512xf32>
    %155 = tpu.matmul %154, %152, %cst_87 {dimension_numbers = #tpu.dot_dimension_numbers<[1], [0], [0], [1], [0, 0, 1, 1], [], []>} : vector<8x4xf32>, vector<4x512xf32>, vector<8x512xf32> -> vector<8x512xf32>
    %156 = arith.addf %147, %155 : vector<8x512xf32>
    %c1_i32 = arith.constant 1 : i32
    %157 = tpu.dynamic_rotate %123 by %c1_i32 dim 1 : vector<4x512xf32>, i32 -> vector<4x512xf32>
    %c3 = arith.constant 3 : index
    %c0_88 = arith.constant 0 : index
    %c0_89 = arith.constant 0 : index
    %158 = vector.load %arg2[%c3, %c0_88, %c0_89] : memref<9x1x512xf32, #tpu.memory_space<vmem>>, vector<1x1x512xf32>
    %159 = vector.shape_cast %158 : vector<1x1x512xf32> to vector<1x512xf32>
    %160 = vector.broadcast %159 : vector<1x512xf32> to vector<4x512xf32>
    %161 = arith.mulf %157, %160 : vector<4x512xf32>
    %c3_90 = arith.constant 3 : index
    %c0_91 = arith.constant 0 : index
    %c0_92 = arith.constant 0 : index
    %162 = vector.load %arg21[%c3_90, %c0_91, %c0_92] : memref<9x8x4xf32, #tpu.memory_space<vmem>>, vector<1x8x4xf32>
    %163 = vector.shape_cast %162 : vector<1x8x4xf32> to vector<8x4xf32>
    %cst_93 = arith.constant dense<0.000000e+00> : vector<8x512xf32>
    %164 = tpu.matmul %163, %161, %cst_93 {dimension_numbers = #tpu.dot_dimension_numbers<[1], [0], [0], [1], [0, 0, 1, 1], [], []>} : vector<8x4xf32>, vector<4x512xf32>, vector<8x512xf32> -> vector<8x512xf32>
    %165 = arith.addf %156, %164 : vector<8x512xf32>
    %c4 = arith.constant 4 : index
    %c0_94 = arith.constant 0 : index
    %c0_95 = arith.constant 0 : index
    %166 = vector.load %arg21[%c4, %c0_94, %c0_95] : memref<9x8x4xf32, #tpu.memory_space<vmem>>, vector<1x8x4xf32>
    %167 = vector.shape_cast %166 : vector<1x8x4xf32> to vector<8x4xf32>
    %cst_96 = arith.constant dense<0.000000e+00> : vector<8x512xf32>
    %168 = tpu.matmul %167, %123, %cst_96 {dimension_numbers = #tpu.dot_dimension_numbers<[1], [0], [0], [1], [0, 0, 1, 1], [], []>} : vector<8x4xf32>, vector<4x512xf32>, vector<8x512xf32> -> vector<8x512xf32>
    %169 = arith.addf %165, %168 : vector<8x512xf32>
    %c511_i32 = arith.constant 511 : i32
    %170 = tpu.dynamic_rotate %123 by %c511_i32 dim 1 : vector<4x512xf32>, i32 -> vector<4x512xf32>
    %c5 = arith.constant 5 : index
    %c0_97 = arith.constant 0 : index
    %c0_98 = arith.constant 0 : index
    %171 = vector.load %arg2[%c5, %c0_97, %c0_98] : memref<9x1x512xf32, #tpu.memory_space<vmem>>, vector<1x1x512xf32>
    %172 = vector.shape_cast %171 : vector<1x1x512xf32> to vector<1x512xf32>
    %173 = vector.broadcast %172 : vector<1x512xf32> to vector<4x512xf32>
    %174 = arith.mulf %170, %173 : vector<4x512xf32>
    %c5_99 = arith.constant 5 : index
    %c0_100 = arith.constant 0 : index
    %c0_101 = arith.constant 0 : index
    %175 = vector.load %arg21[%c5_99, %c0_100, %c0_101] : memref<9x8x4xf32, #tpu.memory_space<vmem>>, vector<1x8x4xf32>
    %176 = vector.shape_cast %175 : vector<1x8x4xf32> to vector<8x4xf32>
    %cst_102 = arith.constant dense<0.000000e+00> : vector<8x512xf32>
    %177 = tpu.matmul %176, %174, %cst_102 {dimension_numbers = #tpu.dot_dimension_numbers<[1], [0], [0], [1], [0, 0, 1, 1], [], []>} : vector<8x4xf32>, vector<4x512xf32>, vector<8x512xf32> -> vector<8x512xf32>
    %178 = arith.addf %169, %177 : vector<8x512xf32>
    %c497_i32 = arith.constant 497 : i32
    %179 = tpu.dynamic_rotate %123 by %c497_i32 dim 1 : vector<4x512xf32>, i32 -> vector<4x512xf32>
    %c6 = arith.constant 6 : index
    %c0_103 = arith.constant 0 : index
    %c0_104 = arith.constant 0 : index
    %180 = vector.load %arg2[%c6, %c0_103, %c0_104] : memref<9x1x512xf32, #tpu.memory_space<vmem>>, vector<1x1x512xf32>
    %181 = vector.shape_cast %180 : vector<1x1x512xf32> to vector<1x512xf32>
    %182 = vector.broadcast %181 : vector<1x512xf32> to vector<4x512xf32>
    %183 = arith.mulf %179, %182 : vector<4x512xf32>
    %c6_105 = arith.constant 6 : index
    %c0_106 = arith.constant 0 : index
    %c0_107 = arith.constant 0 : index
    %184 = vector.load %arg21[%c6_105, %c0_106, %c0_107] : memref<9x8x4xf32, #tpu.memory_space<vmem>>, vector<1x8x4xf32>
    %185 = vector.shape_cast %184 : vector<1x8x4xf32> to vector<8x4xf32>
    %cst_108 = arith.constant dense<0.000000e+00> : vector<8x512xf32>
    %186 = tpu.matmul %185, %183, %cst_108 {dimension_numbers = #tpu.dot_dimension_numbers<[1], [0], [0], [1], [0, 0, 1, 1], [], []>} : vector<8x4xf32>, vector<4x512xf32>, vector<8x512xf32> -> vector<8x512xf32>
    %187 = arith.addf %178, %186 : vector<8x512xf32>
    %c496_i32 = arith.constant 496 : i32
    %188 = tpu.dynamic_rotate %123 by %c496_i32 dim 1 : vector<4x512xf32>, i32 -> vector<4x512xf32>
    %c7 = arith.constant 7 : index
    %c0_109 = arith.constant 0 : index
    %c0_110 = arith.constant 0 : index
    %189 = vector.load %arg2[%c7, %c0_109, %c0_110] : memref<9x1x512xf32, #tpu.memory_space<vmem>>, vector<1x1x512xf32>
    %190 = vector.shape_cast %189 : vector<1x1x512xf32> to vector<1x512xf32>
    %191 = vector.broadcast %190 : vector<1x512xf32> to vector<4x512xf32>
    %192 = arith.mulf %188, %191 : vector<4x512xf32>
    %c7_111 = arith.constant 7 : index
    %c0_112 = arith.constant 0 : index
    %c0_113 = arith.constant 0 : index
    %193 = vector.load %arg21[%c7_111, %c0_112, %c0_113] : memref<9x8x4xf32, #tpu.memory_space<vmem>>, vector<1x8x4xf32>
    %194 = vector.shape_cast %193 : vector<1x8x4xf32> to vector<8x4xf32>
    %cst_114 = arith.constant dense<0.000000e+00> : vector<8x512xf32>
    %195 = tpu.matmul %194, %192, %cst_114 {dimension_numbers = #tpu.dot_dimension_numbers<[1], [0], [0], [1], [0, 0, 1, 1], [], []>} : vector<8x4xf32>, vector<4x512xf32>, vector<8x512xf32> -> vector<8x512xf32>
    %196 = arith.addf %187, %195 : vector<8x512xf32>
    %c495_i32 = arith.constant 495 : i32
    %197 = tpu.dynamic_rotate %123 by %c495_i32 dim 1 : vector<4x512xf32>, i32 -> vector<4x512xf32>
    %c8 = arith.constant 8 : index
    %c0_115 = arith.constant 0 : index
    %c0_116 = arith.constant 0 : index
    %198 = vector.load %arg2[%c8, %c0_115, %c0_116] : memref<9x1x512xf32, #tpu.memory_space<vmem>>, vector<1x1x512xf32>
    %199 = vector.shape_cast %198 : vector<1x1x512xf32> to vector<1x512xf32>
    %200 = vector.broadcast %199 : vector<1x512xf32> to vector<4x512xf32>
    %201 = arith.mulf %197, %200 : vector<4x512xf32>
    %c8_117 = arith.constant 8 : index
    %c0_118 = arith.constant 0 : index
    %c0_119 = arith.constant 0 : index
    %202 = vector.load %arg21[%c8_117, %c0_118, %c0_119] : memref<9x8x4xf32, #tpu.memory_space<vmem>>, vector<1x8x4xf32>
    %203 = vector.shape_cast %202 : vector<1x8x4xf32> to vector<8x4xf32>
    %cst_120 = arith.constant dense<0.000000e+00> : vector<8x512xf32>
    %204 = tpu.matmul %203, %201, %cst_120 {dimension_numbers = #tpu.dot_dimension_numbers<[1], [0], [0], [1], [0, 0, 1, 1], [], []>} : vector<8x4xf32>, vector<4x512xf32>, vector<8x512xf32> -> vector<8x512xf32>
    %205 = arith.addf %196, %204 : vector<8x512xf32>
    %c0_121 = arith.constant 0 : index
    %c0_122 = arith.constant 0 : index
    %206 = vector.load %arg22[%c0_121, %c0_122] : memref<8x1xf32, #tpu.memory_space<vmem>>, vector<8x1xf32>
    %207 = vector.broadcast %206 : vector<8x1xf32> to vector<8x512xf32>
    %208 = arith.addf %205, %207 : vector<8x512xf32>
    %cst_123 = arith.constant 0.000000e+00 : f32
    %209 = vector.broadcast %cst_123 : f32 to vector<8x512xf32>
    %210 = arith.maximumf %208, %209 : vector<8x512xf32>
    %c0_124 = arith.constant 0 : index
    %c0_125 = arith.constant 0 : index
    %211 = vector.load %arg23[%c0_124, %c0_125] : memref<16x512xf32, #tpu.memory_space<vmem>>, vector<8x512xf32>
    tpu.vector_store %arg23[%c0_124, %c0_125], %130 {strides = array<i32>} : memref<16x512xf32, #tpu.memory_space<vmem>>, vector<8x512xf32>,
    %c8_126 = arith.constant 8 : index
    %c0_127 = arith.constant 0 : index
    %212 = vector.load %arg23[%c8_126, %c0_127] : memref<16x512xf32, #tpu.memory_space<vmem>>, vector<8x512xf32>
    tpu.vector_store %arg23[%c8_126, %c0_127], %210 {strides = array<i32>} : memref<16x512xf32, #tpu.memory_space<vmem>>, vector<8x512xf32>,
    return
  }
}

</mosaic_0001>

<bundles_post_ra>
// kernel: _lambda_.1
= control target key start
LH: loop header
LB: loop body
LE: loop exit
PB: predicated region body
PF: predicated region fallthrough
CT: control target
= control target key end

     0   :  { %v2368_v3 = vmov 0   ;;  %vm121_vm0 = vcmask 588800   ;;  %vm363_vm1 = vcmask 1045504   ;;  %vm210_vm2 = vcmask 64512   ;;  %s2371_s28 = smov 15   ;;  %s2375_s30 = smov 112   ;;  %s3136_s0 = inlined_call_operand.vmem [shape: f32[72,512], index: 0, kind: input, shape index: {}]   ;;  %s3137_s3 = inlined_call_operand.vmem [shape: f32[8,72], index: 3, kind: input, shape index: {}]   ;;  %s3138_s4 = inlined_call_operand.vmem [shape: f32[8,1], index: 4, kind: input, shape index: {}]   ;;  %s3139_s1 = inlined_call_operand.vmem [shape: f32[6,512], index: 1, kind: input, shape index: {}]   ;;  %s3140_s5 = inlined_call_operand.vmem [shape: f32[4,8], index: 5, kind: input, shape index: {}]   ;;  %s3141_s8 = inlined_call_operand.vmem [shape: f32[4,6], index: 8, kind: input, shape index: {}]   ;;  %s3142_s12 = inlined_call_operand.<no memory space> [shape: f32[1,1], index: 12, kind: input, shape index: {}]   ;;  %s3143_s13 = inlined_call_operand.<no memory space> [shape: f32[1,1], index: 13, kind: input, shape index: {}]   ;;  %s3144_s6 = inlined_call_operand.vmem [shape: f32[4,1], index: 6, kind: input, shape index: {}]   ;;  %s3145_s7 = inlined_call_operand.vmem [shape: f32[4,1], index: 7, kind: input, shape index: {}]   ;;  %s3146_s9 = inlined_call_operand.vmem [shape: f32[4,1], index: 9, kind: input, shape index: {}]   ;;  %s3147_s16 = inlined_call_operand.vmem [shape: f32[4,1], index: 16, kind: input, shape index: {}]   ;;  %s3148_s11 = inlined_call_operand.vmem [shape: f32[4,1], index: 11, kind: input, shape index: {}]   ;;  %s3149_s10 = inlined_call_operand.vmem [shape: f32[4,1], index: 10, kind: input, shape index: {}]   ;;  %s3150_s17 = inlined_call_operand.vmem [shape: f32[4,1], index: 17, kind: input, shape index: {}]   ;;  %s3151_s15 = inlined_call_operand.vmem [shape: f32[4,8], index: 15, kind: input, shape index: {}]   ;;  %s3152_s14 = inlined_call_operand.vmem [shape: f32[4,6], index: 14, kind: input, shape index: {}]   ;;  %s3153_s18 = inlined_call_operand.vmem [shape: f32[4,1], index: 18, kind: input, shape index: {}]   ;;  %s3154_s19 = inlined_call_operand.vmem [shape: f32[8,4], index: 19, kind: input, shape index: {}]   ;;  %s3155_s22 = inlined_call_operand.vmem [shape: f32[8,1], index: 22, kind: input, shape index: {}]   ;;  %s3156_s20 = inlined_call_operand.vmem [shape: f32[8,1], index: 20, kind: input, shape index: {}]   ;;  %s3157_s2 = inlined_call_operand.vmem [shape: f32[9,1,512], index: 2, kind: input, shape index: {}]   ;;  %s3158_s21 = inlined_call_operand.vmem [shape: f32[9,8,4], index: 21, kind: input, shape index: {}]   ;;  %s3159_s23 = inlined_call_operand.vmem [shape: f32[16,512], index: 23, kind: output, shape index: {}]  }
   0x1   :  { %3163 = sst [smem:[#allocation4_spill]] %s3136_s0  ;;  %2341 = vset.pattern.permute.xlu0 %v2368_v3  ;;  %2342 = vset.pattern.permute.xlu2 %v2368_v3  ;;  %vm359_vm3 = vcmask 48128   ;;  %vm3162_vm4 = vcmask 1043456   ;;  %s2372_s0 = smov 1  }
   0x2   :  { %3164 = sst [smem:[#allocation5_spill]] %s3137_s3  ;;  %2343 = vset.pattern.permute.xlu1 %v2368_v3  ;;  %s2376_s25 = smov 111  }
   0x3   :  { %3165 = sst [smem:[#allocation6_spill]] %s3138_s4 }
   0x4   :  { %3166 = sst [smem:[#allocation7_spill]] %s3139_s1 }
   0x5   :  { %3167 = sst [smem:[#allocation8_spill]] %s3140_s5 }
   0x6   :  { %3168 = sst [smem:[#allocation9_spill]] %s3141_s8 }
   0x7   :  { %3169 = sst [smem:[#allocation10_spill]] %s3142_s12 }
   0x8   :  { %3170 = sst [smem:[#allocation11_spill]] %s3143_s13 }
   0x9   :  { %s3171_s24 = sld [smem:[#allocation4_spill]] }
   0xa   :  { %s3172_s5 = sld [smem:[#allocation5_spill]] }
   0xb   :  { %s3173_s12 = sld [smem:[#allocation6_spill]] }
   0xc   :  { %s3174_s13 = sld [smem:[#allocation7_spill]] }
   0xd   :  { %s3178_s1 = sld [smem:[#allocation11_spill]] }
   0xf   :  { %v113_v0 = vld [vmem:[%s3171_s24 + $0x110] sm:$0xff]  ;;  %v114_v1 = vld [vmem:[%s3171_s24 + $0x118] sm:$0xff]  ;;  %v111_v5 = vld [vmem:[%s3171_s24 + $0x100] sm:$0xff] }
  0x10   :  { %v109_v2 = vld [vmem:[%s3171_s24 + $0xf0] sm:$0xff]  ;;  %172 = vmatpush.msra.mxu2 %v113_v0  ;;  %192 = vmatpush.msra.mxu3 %v114_v1  ;;  %v110_v4 = vld [vmem:[%s3171_s24 + $0xf8] sm:$0xff]  ;;  %v112_v6 = vld [vmem:[%s3171_s24 + $0x108] sm:$0xff] }
  0x11   :  { %132 = vmatpush.msra.mxu0 %v111_v5  ;;  %152 = vmatpush.msra.mxu1 %v112_v6  ;;  %v105_v7 = vld [vmem:[%s3171_s24 + $0xd0] sm:$0xff]  ;;  %v106_v8 = vld [vmem:[%s3171_s24 + $0xd8] sm:$0xff]  ;;  %v107_v9 = vld [vmem:[%s3171_s24 + $0xe0] sm:$0xff] }
  0x12   :  { %173 = vmatpush.msra.mxu2 %v109_v2  ;;  %193 = vmatpush.msra.mxu3 %v110_v4  ;;  %v108_v10 = vld [vmem:[%s3171_s24 + $0xe8] sm:$0xff]  ;;  %v101_v11 = vld [vmem:[%s3171_s24 + $0xb0] sm:$0xff]  ;;  %v102_v12 = vld [vmem:[%s3171_s24 + $0xb8] sm:$0xff] }
  0x13   :  { %133 = vmatpush.msra.mxu0 %v107_v9  ;;  %153 = vmatpush.msra.mxu1 %v108_v10  ;;  %v103_v13 = vld [vmem:[%s3171_s24 + $0xc0] sm:$0xff]  ;;  %v104_v14 = vld [vmem:[%s3171_s24 + $0xc8] sm:$0xff]  ;;  %v97_v17 = vld [vmem:[%s3171_s24 + $0x90] sm:$0xff]  ;;  %v30_v57 = vstv %s3178_s1 }
  0x14   :  { %174 = vmatpush.msra.mxu2 %v105_v7  ;;  %194 = vmatpush.msra.mxu3 %v106_v8  ;;  %v99_v15 = vld [vmem:[%s3171_s24 + $0xa0] sm:$0xff]  ;;  %v100_v16 = vld [vmem:[%s3171_s24 + $0xa8] sm:$0xff]  ;;  %v98_v18 = vld [vmem:[%s3171_s24 + $0x98] sm:$0xff]  ;;  %31 = vst [vmem:[#allocation3] sm:$0x1] %v30_v57 }
  0x15   :  { %134 = vmatpush.msra.mxu0 %v103_v13  ;;  %154 = vmatpush.msra.mxu1 %v104_v14  ;;  %v95_v19 = vld [vmem:[%s3171_s24 + $0x80] sm:$0xff]  ;;  %v96_v20 = vld [vmem:[%s3171_s24 + $0x88] sm:$0xff]  ;;  %v93_v21 = vld [vmem:[%s3171_s24 + $0x70] sm:$0xff] }
  0x16   :  { %175 = vmatpush.msra.mxu2 %v101_v11  ;;  %195 = vmatpush.msra.mxu3 %v102_v12  ;;  %v94_v22 = vld [vmem:[%s3171_s24 + $0x78] sm:$0xff]  ;;  %v91_v23 = vld [vmem:[%s3171_s24 + $0x60] sm:$0xff]  ;;  %v92_v24 = vld [vmem:[%s3171_s24 + $0x68] sm:$0xff] }
  0x17   :  { %135 = vmatpush.msra.mxu0 %v99_v15  ;;  %155 = vmatpush.msra.mxu1 %v100_v16  ;;  %v89_v25 = vld [vmem:[%s3171_s24 + $0x50] sm:$0xff]  ;;  %v90_v26 = vld [vmem:[%s3171_s24 + $0x58] sm:$0xff]  ;;  %v87_v27 = vld [vmem:[%s3171_s24 + $0x40] sm:$0xff] }
  0x18   :  { %176 = vmatpush.msra.mxu2 %v97_v17  ;;  %196 = vmatpush.msra.mxu3 %v98_v18  ;;  %v88_v28 = vld [vmem:[%s3171_s24 + $0x48] sm:$0xff]  ;;  %v85_v29 = vld [vmem:[%s3171_s24 + $0x30] sm:$0xff]  ;;  %v86_v30 = vld [vmem:[%s3171_s24 + $0x38] sm:$0xff] }
  0x19   :  { %136 = vmatpush.msra.mxu0 %v95_v19  ;;  %156 = vmatpush.msra.mxu1 %v96_v20  ;;  %v83_v31 = vld [vmem:[%s3171_s24 + $0x20] sm:$0xff]  ;;  %v84_v32 = vld [vmem:[%s3171_s24 + $0x28] sm:$0xff]  ;;  %v81_v33 = vld [vmem:[%s3171_s24 + $0x10] sm:$0xff] }
  0x1a   :  { %177 = vmatpush.msra.mxu2 %v93_v21  ;;  %197 = vmatpush.msra.mxu3 %v94_v22  ;;  %v82_v34 = vld [vmem:[%s3171_s24 + $0x18] sm:$0xff]  ;;  %v78_v35 = vld [vmem:[%s3172_s5] sm:$0xff]  ;;  %v80_v37 = vld [vmem:[%s3171_s24 + $0x8] sm:$0xff]  ;;  %s3175_s5 = sld [smem:[#allocation8_spill]] }
  0x1b   :  { %137 = vmatpush.msra.mxu0 %v91_v23  ;;  %157 = vmatpush.msra.mxu1 %v92_v24  ;;  %v79_v36 = vld [vmem:[%s3171_s24] sm:$0xff]  ;;  %v2622_v45 = vld [vmem:[%s3174_s13 + $0x8] sm:$0x3f]  ;;  %v2636_v51 = vld [vmem:[%s3174_s13 + $0x18] sm:$0x3f] }
  0x1c   :  { %178 = vmatpush.msra.mxu2 %v89_v25  ;;  %198 = vmatpush.msra.mxu3 %v90_v26  ;;  %v115_v38 = vld [vmem:[%s3173_s12] sm:$0xff]  ;;  %v2641_v52 = vld [vmem:[%s3174_s13 + $0x10] sm:$0x3f]  ;;  %s3176_s12 = sld [smem:[#allocation9_spill]] }
  0x1d   :  { %138 = vmatpush.msra.mxu0 %v87_v27  ;;  %158 = vmatpush.msra.mxu1 %v88_v28  ;;  %v2617_v44 = vld [vmem:[%s3174_s13] sm:$0x3f]  ;;  %s3177_s13 = sld [smem:[#allocation10_spill]] }
  0x1e   :  { %179 = vmatpush.msra.mxu2 %v85_v29  ;;  %199 = vmatpush.msra.mxu3 %v86_v30  ;;  %v294_v13 = vld [vmem:[%s3144_s6] sm:$0xf] }
  0x1f   :  { %139 = vmatpush.msra.mxu0 %v83_v31  ;;  %159 = vmatpush.msra.mxu1 %v84_v32  ;;  %v295_v15 = vld [vmem:[%s3145_s7] sm:$0xf] }
  0x20   :  { %180 = vmatpush.msra.mxu2 %v81_v33  ;;  %200 = vmatpush.msra.mxu3 %v82_v34  ;;  %v209_v46 = vld [vmem:[%s3175_s5] sm:$0xf]  ;;  %s2374_s5 = smov 113  }
  0x21   :  { %2207 = vmatmul.msk.f32.vlgmr.msra.gmra.mxu2 %vm121_vm0, %v78_v35  ;;  %2208 = vmatmul.msk.f32.vlgmr.msra.gmra.mxu3 %vm121_vm0, %v78_v35  ;;  %v566_v17 = vld [vmem:[#allocation3] sm:$0x1] }
  0x22   :  { %140 = vmatpush.msra.mxu0 %v79_v36  ;;  %160 = vmatpush.msra.mxu1 %v80_v37  ;;  %v358_v53 = vld [vmem:[%s3176_s12] sm:$0xf] }
  0x23   :  { %2205 = vmatmul.msk.f32.vlgmr.msra.gmra.mxu0 %vm121_vm0, %v78_v35  ;;  %2206 = vmatmul.msk.f32.vlgmr.msra.gmra.mxu1 %vm121_vm0, %v78_v35  ;;  %v28_v54 = vstv %s3177_s13  ;;  %v456_v18 = vld [vmem:[%s3146_s9] sm:$0xf]  ;;  %s2370_s13 = smov 17  }
  0x24   :  { %118 = vperm.xlu0 %2341, %v115_v38   ;;  %29 = vst [vmem:[#allocation2] sm:$0x1] %v28_v54  ;;  %342 = vperm.xlu2 %2342, %v294_v13   ;;  %v882_v19 = vld [vmem:[%s3147_s16] sm:$0xf] }
  0x2b   :  { %v565_v16 = vld [vmem:[#allocation2] sm:$0x1] }
  0x2c   :  { %351 = vperm.xlu2 %2342, %v295_v15  }
  0x96   :  { %v119_v39 = vpop.permute.xlu0 %118 }
  0xa0   :  { %v142_v40 = vpop.f32.mrf.mxu0  ;;  %v162_v41 = vpop.f32.mrf.mxu1 }
  0xa1   :  { %v143_v42 = vadd.f32 %v142_v40, %v119_v39  ;;  %v163_v43 = vadd.f32 %v162_v41, %v119_v39 }
  0xa3   :  { %229 = vmatpush.msrb.mxu0 %v143_v42  ;;  %249 = vmatpush.msrb.mxu1 %v163_v43 }
  0xa4   :  { %v182_v47 = vpop.f32.mrf.mxu2  ;;  %v202_v48 = vpop.f32.mrf.mxu3  ;;  %2209 = vmatmul.msk.f32.vlgmr.msrb.gmra.mxu0 %vm210_vm2, %v209_v46  ;;  %2210 = vmatmul.msk.f32.vlgmr.msrb.gmra.mxu1 %vm210_vm2, %v209_v46 }
  0xa5   :  { %2213 = vmatpush.msk.msra.mxu0 %vm363_vm1, %v2617_v44  ;;  %2215 = vmatpush.msk.msra.mxu1 %vm363_vm1, %v2622_v45  ;;  %v183_v49 = vadd.f32 %v182_v47, %v119_v39  ;;  %v203_v50 = vadd.f32 %v202_v48, %v119_v39 }
  0xa7   :  { %722 = vmatpush.msrb.mxu0 %v143_v42  ;;  %742 = vmatpush.msrb.mxu1 %v163_v43 }
  0xa8   :  { %269 = vmatpush.msrb.mxu2 %v183_v49  ;;  %289 = vmatpush.msrb.mxu3 %v203_v50 }
  0xa9   :  { %2211 = vmatmul.msk.f32.vlgmr.msrb.gmra.mxu2 %vm210_vm2, %v209_v46  ;;  %2212 = vmatmul.msk.f32.vlgmr.msrb.gmra.mxu3 %vm210_vm2, %v209_v46 }
  0xaa   :  { %2219 = vmatpush.msk.msra.mxu3 %vm363_vm1, %v2636_v51  ;;  %2217 = vmatpush.msk.msra.mxu2 %vm363_vm1, %v2641_v52 }
  0xac   :  { %762 = vmatpush.msrb.mxu2 %v183_v49  ;;  %782 = vmatpush.msrb.mxu3 %v203_v50 }
  0xad   :  { %2214 = vmatmul.msk.f32.vlgmr.msra.gmra.mxu0 %vm359_vm3, %v358_v53  ;;  %2216 = vmatmul.msk.f32.vlgmr.msra.gmra.mxu1 %vm359_vm3, %v358_v53 }
  0xb1   :  { %2218 = vmatmul.msk.f32.vlgmr.msra.gmra.mxu2 %vm359_vm3, %v358_v53  ;;  %2220 = vmatmul.msk.f32.vlgmr.msra.gmra.mxu3 %vm359_vm3, %v358_v53 }
 0x121   :  { %v231_v55 = vpop.f32.mrf.mxu0  ;;  %v251_v56 = vpop.f32.mrf.mxu1 }
 0x122   :  { %v297_v58 = vsel %vm3162_vm4, %v231_v55, 0.0  ;;  %v298_v59 = vsel %vm3162_vm4, %v251_v56, 0.0 }
 0x123   :  { %v299_v60 = vadd.f32 %v298_v59, %v297_v58  ;;  %v527_v58 = vld [vmem:[%s3148_s11] sm:$0xf] }
 0x124   :  { %v457_v59 = vld [vmem:[%s3149_s10] sm:$0xf] }
 0x12a   :  { %v393_v61 = vpop.f32.mrf.mxu0  ;;  %v413_v63 = vpop.f32.mrf.mxu1 }
 0x12b   :  { %v458_v4 = vsel %vm3162_vm4, %v393_v61, 0.0  ;;  %v459_v5 = vsel %vm3162_vm4, %v413_v63, 0.0 }
 0x12c   :  { %v271_v62 = vpop.f32.mrf.mxu2  ;;  %v291_v1 = vpop.f32.mrf.mxu3  ;;  %v460_v7 = vadd.f32 %v459_v5, %v458_v4 }
 0x12d   :  { %v300_v0 = vsel %vm3162_vm4, %v271_v62, 0.0  ;;  %v302_v3 = vsel %vm3162_vm4, %v291_v1, 0.0 }
 0x12e   :  { %v301_v2 = vadd.f32 %v300_v0, %v299_v60  ;;  %v343_v60 = vpop.permute.xlu2 %342 }
 0x130   :  { %v303_v6 = vadd.f32 %v302_v3, %v301_v2 }
 0x132   :  { %304 = vadd.xlane.f32.xlu0 %v303_v6 }
 0x134   :  { %v433_v8 = vpop.f32.mrf.mxu2  ;;  %v453_v10 = vpop.f32.mrf.mxu3 }
 0x135   :  { %v461_v9 = vsel %vm3162_vm4, %v433_v8, 0.0  ;;  %v463_v12 = vsel %vm3162_vm4, %v453_v10, 0.0 }
 0x136   :  { %v462_v11 = vadd.f32 %v461_v9, %v460_v7 }
 0x138   :  { %v464_v14 = vadd.f32 %v463_v12, %v462_v11 }
 0x13a   :  { %465 = vadd.xlane.f32.xlu1 %v464_v14 }
 0x146   :  { %604 = vperm.xlu0 %2341, %v565_v16  }
 0x14e   :  { %614 = vperm.xlu0 %2341, %v566_v17  }
 0x153   :  { %503 = vperm.xlu1 %2343, %v456_v18  }
 0x156   :  { %885 = vperm.xlu0 %2341, %v882_v19  }
 0x1a5   :  { %v305_v20 = vpop.xlane.xlu0 %304 }
 0x1a6   :  { %v306_v21 = vmul.f32 0.001953125, %v305_v20 }
 0x1a8   :  { %v2682_v22 = vsub.f32 %v231_v55, %v306_v21  ;;  %v2684_v23 = vsub.f32 %v251_v56, %v306_v21  ;;  %v2686_v24 = vsub.f32 %v271_v62, %v306_v21  ;;  %v2688_v25 = vsub.f32 %v291_v1, %v306_v21  ;;  %v352_v62 = vpop.permute.xlu2 %351 }
 0x1aa   :  { %v311_v26 = vmul.f32 %v2682_v22, %v2682_v22  ;;  %v312_v27 = vmul.f32 %v2684_v23, %v2684_v23  ;;  %v313_v28 = vmul.f32 %v2686_v24, %v2686_v24  ;;  %v314_v29 = vmul.f32 %v2688_v25, %v2688_v25 }
 0x1ac   :  { %v315_v30 = vsel %vm3162_vm4, %v311_v26, 0.0  ;;  %v316_v31 = vsel %vm3162_vm4, %v312_v27, 0.0  ;;  %v318_v35 = vsel %vm3162_vm4, %v313_v28, 0.0  ;;  %v320_v37 = vsel %vm3162_vm4, %v314_v29, 0.0 }
 0x1ad   :  { %v466_v32 = vpop.xlane.xlu1 %465  ;;  %v317_v33 = vadd.f32 %v316_v31, %v315_v30 }
 0x1ae   :  { %v467_v34 = vmul.f32 0.001953125, %v466_v32 }
 0x1af   :  { %v319_v36 = vadd.f32 %v318_v35, %v317_v33 }
 0x1b0   :  { %v2702_v38 = vsub.f32 %v393_v61, %v467_v34  ;;  %v2704_v39 = vsub.f32 %v413_v63, %v467_v34  ;;  %v2706_v40 = vsub.f32 %v433_v8, %v467_v34  ;;  %v2708_v41 = vsub.f32 %v453_v10, %v467_v34 }
 0x1b1   :  { %v321_v42 = vadd.f32 %v320_v37, %v319_v36 }
 0x1b2   :  { %v472_v43 = vmul.f32 %v2702_v38, %v2702_v38  ;;  %v473_v46 = vmul.f32 %v2704_v39, %v2704_v39  ;;  %v474_v47 = vmul.f32 %v2706_v40, %v2706_v40  ;;  %v475_v48 = vmul.f32 %v2708_v41, %v2708_v41 }
 0x1b3   :  { %322 = vadd.xlane.f32.xlu1 %v321_v42 }
 0x1b4   :  { %v476_v49 = vsel %vm3162_vm4, %v472_v43, 0.0  ;;  %v477_v50 = vsel %vm3162_vm4, %v473_v46, 0.0  ;;  %v479_v54 = vsel %vm3162_vm4, %v474_v47, 0.0  ;;  %v481_v56 = vsel %vm3162_vm4, %v475_v48, 0.0 }
 0x1b5   :  { %v478_v53 = vadd.f32 %v477_v50, %v476_v49 }
 0x1b7   :  { %v480_v55 = vadd.f32 %v479_v54, %v478_v53 }
 0x1b9   :  { %v482_v57 = vadd.f32 %v481_v56, %v480_v55 }
 0x1bb   :  { %483 = vadd.xlane.f32.xlu2 %v482_v57 }
 0x1c5   :  { %v504_v61 = vpop.permute.xlu1 %503 }
 0x1cc   :  { %530 = vperm.xlu1 %2343, %v527_v58  }
 0x1d3   :  { %512 = vperm.xlu2 %2342, %v457_v59  }
 0x226   :  { %v323_v63 = vpop.xlane.xlu1 %322 }
 0x227   :  { %v324_v0 = vmul.f32 0.001953125, %v323_v63 }
 0x229   :  { %v325_v1 = vadd.f32 1e-05, %v324_v0 }
 0x22b   :  { %2344 = vrsqrt.f32 %v325_v1  ;;  %vm332_vm6 = vweird.f32 %v325_v1 }
 0x22e   :  { %v484_v2 = vpop.xlane.xlu2 %483 }
 0x22f   :  { %v485_v3 = vmul.f32 0.001953125, %v484_v2 }
 0x231   :  { %v2345_v4 = vpop.eup %2344  ;;  %v486_v5 = vadd.f32 1e-05, %v485_v3 }
 0x232   :  { %v327_v6 = vmul.f32 %v2345_v4, %v325_v1  ;;  %vm333_vm5 = vweird.f32 %v2345_v4 }
 0x233   :  { %2346 = vrsqrt.f32 %v486_v5  ;;  %vm334_vm7 = vmor %vm332_vm6, %vm333_vm5  ;;  %vm493_vm9 = vweird.f32 %v486_v5 }
 0x234   :  { %v328_v7 = vmul.f32 %v2345_v4, %v327_v6 }
 0x236   :  { %v329_v8 = vmul.f32 0.5, %v328_v7  ;;  %v513_v35 = vpop.permute.xlu2 %512 }
 0x238   :  { %v330_v9 = vsub.f32 1.5, %v329_v8 }
 0x239   :  { %v2347_v10 = vpop.eup %2346 }
 0x23a   :  { %v331_v11 = vmul.f32 %v2345_v4, %v330_v9  ;;  %v488_v12 = vmul.f32 %v2347_v10, %v486_v5  ;;  %vm494_vm8 = vweird.f32 %v2347_v10 }
 0x23b   :  { %vm495_vm10 = vmor %vm493_vm9, %vm494_vm8 }
 0x23c   :  { %v335_v13 = vsel %vm334_vm7, %v2345_v4, %v331_v11  ;;  %v489_v14 = vmul.f32 %v2347_v10, %v488_v12 }
 0x23d   :  { %v336_v16 = vmul.f32 %v335_v13, %v2682_v22  ;;  %v337_v17 = vmul.f32 %v335_v13, %v2684_v23  ;;  %v338_v18 = vmul.f32 %v335_v13, %v2686_v24  ;;  %v339_v19 = vmul.f32 %v335_v13, %v2688_v25 }
 0x23e   :  { %v490_v15 = vmul.f32 0.5, %v489_v14  ;;  %v531_v56 = vpop.permute.xlu1 %530 }
 0x23f   :  { %v345_v26 = vmul.f32 %v343_v60, %v336_v16  ;;  %v346_v28 = vmul.f32 %v343_v60, %v337_v17  ;;  %v347_v29 = vmul.f32 %v343_v60, %v338_v18  ;;  %v348_v30 = vmul.f32 %v343_v60, %v339_v19 }
 0x240   :  { %v491_v20 = vsub.f32 1.5, %v490_v15 }
 0x241   :  { %v354_v36 = vadd.f32 %v352_v62, %v345_v26  ;;  %v355_v37 = vadd.f32 %v352_v62, %v346_v28  ;;  %v356_v42 = vadd.f32 %v352_v62, %v347_v29  ;;  %v357_v43 = vadd.f32 %v352_v62, %v348_v30 }
 0x242   :  { %v492_v21 = vmul.f32 %v2347_v10, %v491_v20 }
 0x244   :  { %v496_v27 = vsel %vm495_vm10, %v2347_v10, %v492_v21 }
 0x245   :  { %v497_v31 = vmul.f32 %v496_v27, %v2702_v38  ;;  %v498_v22 = vmul.f32 %v496_v27, %v2704_v39  ;;  %v499_v32 = vmul.f32 %v496_v27, %v2706_v40  ;;  %v500_v23 = vmul.f32 %v496_v27, %v2708_v41 }
 0x247   :  { %v506_v24 = vmul.f32 %v504_v61, %v497_v31  ;;  %v507_v33 = vmul.f32 %v504_v61, %v498_v22  ;;  %v508_v25 = vmul.f32 %v504_v61, %v499_v32  ;;  %v509_v34 = vmul.f32 %v504_v61, %v500_v23 }
 0x249   :  { %v515_v46 = vadd.f32 %v513_v35, %v506_v24  ;;  %v516_v47 = vadd.f32 %v513_v35, %v507_v33  ;;  %v517_v48 = vadd.f32 %v513_v35, %v508_v25  ;;  %v518_v49 = vadd.f32 %v513_v35, %v509_v34 }
 0x24b   :  { %v519_v38 = vadd.f32 %v515_v46, %v354_v36  ;;  %v520_v50 = vadd.f32 %v516_v47, %v355_v37  ;;  %v521_v39 = vadd.f32 %v517_v48, %v356_v42  ;;  %v522_v53 = vadd.f32 %v518_v49, %v357_v43  ;;  %v896_v47 = vld [vmem:[%s3150_s17] sm:$0xf] }
 0x24d   :  { %v523_v40 = vmax.f32 %v519_v38, 0.0  ;;  %v524_v54 = vmax.f32 %v520_v50, 0.0  ;;  %v525_v41 = vmax.f32 %v521_v39, 0.0  ;;  %v526_v55 = vmax.f32 %v522_v53, 0.0  ;;  %v605_v39 = vpop.permute.xlu0 %604  ;;  %v703_v53 = vld [vmem:[%s3151_s15] sm:$0xf] }
 0x24e   :  { %2225 = vmatmul.msk.f32.vlgmr.msrb.gmra.mxu0 %vm210_vm2, %v703_v53  ;;  %2226 = vmatmul.msk.f32.vlgmr.msrb.gmra.mxu1 %vm210_vm2, %v703_v53 }
 0x24f   :  { %v533_v57 = vmul.f32 %v531_v56, %v523_v40  ;;  %v534_v58 = vmul.f32 %v531_v56, %v524_v54  ;;  %v535_v59 = vmul.f32 %v531_v56, %v525_v41  ;;  %v536_v60 = vmul.f32 %v531_v56, %v526_v55  ;;  %2227 = vmatmul.msk.f32.vlgmr.msrb.gmra.mxu2 %vm210_vm2, %v703_v53 }
 0x250   :  { %2228 = vmatmul.msk.f32.vlgmr.msrb.gmra.mxu3 %vm210_vm2, %v703_v53 }
 0x251   :  { %v537_v61 = vsel %vm3162_vm4, %v533_v57, 0.0  ;;  %v544_v62 = vsel %vm3162_vm4, %v534_v58, 0.0  ;;  %v551_v63 = vsel %vm3162_vm4, %v535_v59, 0.0  ;;  %v558_v0 = vsel %vm3162_vm4, %v536_v60, 0.0 }
 0x252   :  { %v538_v1 = vrot.slane %v537_v61, 4  ;;  %v545_v2 = vrot.slane %v544_v62, 4  ;;  %v552_v3 = vrot.slane %v551_v63, 4  ;;  %v559_v4 = vrot.slane %v558_v0, 4 }
 0x253   :  { %v607_v58 = vperm.slane %v605_v39, 0 }
 0x254   :  { %v539_v5 = vadd.f32 %v538_v1, %v537_v61  ;;  %v546_v6 = vadd.f32 %v545_v2, %v544_v62  ;;  %v553_v7 = vadd.f32 %v552_v3, %v551_v63  ;;  %v560_v8 = vadd.f32 %v559_v4, %v558_v0 }
 0x255   :  { %v615_v57 = vpop.permute.xlu0 %614 }
 0x256   :  { %v540_v9 = vrot.slane %v539_v5, 2  ;;  %v547_v10 = vrot.slane %v546_v6, 2  ;;  %v554_v11 = vrot.slane %v553_v7, 2  ;;  %v561_v12 = vrot.slane %v560_v8, 2 }
 0x257   :  { %v617_v0 = vperm.slane %v615_v57, 0 }
 0x258   :  { %v541_v13 = vadd.f32 %v540_v9, %v539_v5  ;;  %v548_v14 = vadd.f32 %v547_v10, %v546_v6  ;;  %v555_v15 = vadd.f32 %v554_v11, %v553_v7  ;;  %v562_v16 = vadd.f32 %v561_v12, %v560_v8 }
 0x25a   :  { %v542_v17 = vrot.slane %v541_v13, 1  ;;  %v549_v18 = vrot.slane %v548_v14, 1  ;;  %v556_v19 = vrot.slane %v555_v15, 1  ;;  %v563_v26 = vrot.slane %v562_v16, 1 }
 0x25c   :  { %v543_v20 = vadd.f32 %v542_v17, %v541_v13  ;;  %v550_v21 = vadd.f32 %v549_v18, %v548_v14  ;;  %v557_v27 = vadd.f32 %v556_v19, %v555_v15  ;;  %v564_v29 = vadd.f32 %v563_v26, %v562_v16 }
 0x25e   :  { %v567_v28 = vadd.f32 %v550_v21, %v543_v20 }
 0x260   :  { %v568_v30 = vadd.f32 %v567_v28, %v557_v27 }
 0x262   :  { %v569_v31 = vadd.f32 %v568_v30, %v564_v29 }
 0x264   :  { %570 = vadd.xlane.f32.xlu2 %v569_v31 }
 0x2d7   :  { %v571_v22 = vpop.xlane.xlu2 %570 }
 0x2d8   :  { %v572_v32 = vmul.f32 0.001953125, %v571_v22 }
 0x2da   :  { %v573_v23 = vsub.f32 %v543_v20, %v572_v32  ;;  %v574_v24 = vsub.f32 %v550_v21, %v572_v32  ;;  %v575_v33 = vsub.f32 %v557_v27, %v572_v32  ;;  %v576_v25 = vsub.f32 %v564_v29, %v572_v32 }
 0x2dc   :  { %v577_v34 = vmul.f32 %v573_v23, %v573_v23  ;;  %v578_v35 = vmul.f32 %v574_v24, %v574_v24  ;;  %v579_v36 = vmul.f32 %v575_v33, %v575_v33  ;;  %v580_v42 = vmul.f32 %v576_v25, %v576_v25 }
 0x2de   :  { %v581_v37 = vadd.f32 %v578_v35, %v577_v34 }
 0x2e0   :  { %v582_v43 = vadd.f32 %v581_v37, %v579_v36 }
 0x2e2   :  { %v583_v46 = vadd.f32 %v582_v43, %v580_v42 }
 0x2e4   :  { %584 = vadd.xlane.f32.xlu1 %v583_v46 }
 0x2fd   :  { %943 = vperm.xlu1 %2343, %v896_v47  }
 0x357   :  { %v585_v48 = vpop.xlane.xlu1 %584 }
 0x358   :  { %v586_v49 = vmul.f32 0.001953125, %v585_v48 }
 0x35a   :  { %v587_v38 = vadd.f32 1e-05, %v586_v49 }
 0x35c   :  { %2348 = vrsqrt.f32 %v587_v38  ;;  %vm594_vm12 = vweird.f32 %v587_v38 }
 0x362   :  { %v2349_v50 = vpop.eup %2348 }
 0x363   :  { %v589_v40 = vmul.f32 %v2349_v50, %v587_v38  ;;  %vm595_vm11 = vweird.f32 %v2349_v50 }
 0x364   :  { %vm596_vm13 = vmor %vm594_vm12, %vm595_vm11 }
 0x365   :  { %v590_v54 = vmul.f32 %v2349_v50, %v589_v40 }
 0x367   :  { %v591_v41 = vmul.f32 0.5, %v590_v54 }
 0x369   :  { %v592_v55 = vsub.f32 1.5, %v591_v41 }
 0x36b   :  { %v593_v56 = vmul.f32 %v2349_v50, %v592_v55 }
 0x36d   :  { %v597_v59 = vsel %vm596_vm13, %v2349_v50, %v593_v56 }
 0x36e   :  { %v598_v60 = vmul.f32 %v597_v59, %v573_v23  ;;  %v599_v61 = vmul.f32 %v597_v59, %v574_v24  ;;  %v600_v62 = vmul.f32 %v597_v59, %v575_v33  ;;  %v601_v63 = vmul.f32 %v597_v59, %v576_v25 }
 0x370   :  { %v608_v1 = vmul.f32 %v607_v58, %v598_v60  ;;  %v609_v2 = vmul.f32 %v607_v58, %v599_v61  ;;  %v610_v3 = vmul.f32 %v607_v58, %v600_v62  ;;  %v611_v4 = vmul.f32 %v607_v58, %v601_v63 }
 0x372   :  { %v618_v5 = vadd.f32 %v617_v0, %v608_v1  ;;  %v619_v6 = vadd.f32 %v617_v0, %v609_v2  ;;  %v620_v7 = vadd.f32 %v617_v0, %v610_v3  ;;  %v621_v8 = vadd.f32 %v617_v0, %v611_v4  ;;  %v702_v1 = vld [vmem:[%s3152_s14] sm:$0xf] }
 0x374   :  { %v2221_v9 = vmul.f32 -1.442695, %v618_v5  ;;  %v2222_v10 = vmul.f32 -1.442695, %v619_v6  ;;  %v2223_v11 = vmul.f32 -1.442695, %v620_v7  ;;  %v744_v7 = vpop.f32.mrf.mxu1 }
 0x375   :  { %v2224_v12 = vmul.f32 -1.442695, %v621_v8  ;;  %v784_v8 = vpop.f32.mrf.mxu3 }
 0x376   :  { %2350 = vpow2.f32 %v2221_v9 }
 0x377   :  { %2352 = vpow2.f32 %v2222_v10 }
 0x378   :  { %2354 = vpow2.f32 %v2223_v11 }
 0x379   :  { %2356 = vpow2.f32 %v2224_v12 }
 0x37c   :  { %v2351_v13 = vpop.eup %2350 }
 0x37d   :  { %v2353_v14 = vpop.eup %2352  ;;  %v634_v15 = vadd.f32 1.0, %v2351_v13 }
 0x37e   :  { %v2355_v16 = vpop.eup %2354  ;;  %v635_v17 = vadd.f32 1.0, %v2353_v14 }
 0x37f   :  { %v2357_v18 = vpop.eup %2356  ;;  %v636_v19 = vadd.f32 1.0, %v2355_v16  ;;  %2358 = vrcp.f32 %v634_v15  ;;  %v647_v21 = vand.u32 2147483647, %v634_v15  ;;  %v649_v26 = vand.u32 2147483648, %v634_v15 }
 0x380   :  { %v2750_v20 = vadd.f32 1.0, %v2357_v18  ;;  %2360 = vrcp.f32 %v635_v17  ;;  %v662_v28 = vand.u32 2147483647, %v635_v17  ;;  %v664_v31 = vand.u32 2147483648, %v635_v17 }
 0x381   :  { %2362 = vrcp.f32 %v636_v19  ;;  %vm643_vm14 = vweird.f32 %v634_v15  ;;  %vm2753_vm15 = vcmp.eq.f32.partialorder %v647_v21, 8.507059e+37  ;;  %vm658_vm0 = vweird.f32 %v635_v17 }
 0x382   :  { %2364 = vrcp.f32 %v2750_v20  ;;  %v650_v25 = vor.u32 1.1754944e-38, %v649_v26  ;;  %vm673_vm2 = vweird.f32 %v636_v19  ;;  %vm2757_vm5 = vcmp.eq.f32.partialorder %v662_v28, 8.507059e+37 }
 0x383   :  { %v677_v37 = vand.u32 2147483647, %v636_v19  ;;  %v665_v46 = vor.u32 1.1754944e-38, %v664_v31  ;;  %v679_v49 = vand.u32 2147483648, %v636_v19  ;;  %v694_v53 = vand.u32 2147483648, %v2750_v20 }
 0x384   :  { %v692_v41 = vand.u32 2147483647, %v2750_v20  ;;  %vm688_vm13 = vweird.f32 %v2750_v20 }
 0x385   :  { %v2359_v27 = vpop.eup %2358  ;;  %vm678_vm12 = vcmp.eq.f32.partialorder %v677_v37, 8.507059e+37  ;;  %v680_v59 = vor.u32 1.1754944e-38, %v679_v49  ;;  %v695_v0 = vor.u32 1.1754944e-38, %v694_v53 }
 0x386   :  { %v2361_v29 = vpop.eup %2360  ;;  %v639_v30 = vmul.f32 %v2359_v27, %v634_v15  ;;  %vm644_vm6 = vweird.f32 %v2359_v27 }
 0x387   :  { %v2363_v22 = vpop.eup %2362  ;;  %v654_v23 = vmul.f32 %v2361_v29, %v635_v17  ;;  %vm659_vm7 = vweird.f32 %v2361_v29  ;;  %vm645_vm9 = vmor %vm643_vm14, %vm644_vm6 }
 0x388   :  { %v2365_v24 = vpop.eup %2364  ;;  %v640_v33 = vsub.f32 1.0, %v639_v30  ;;  %v669_v34 = vmul.f32 %v2363_v22, %v636_v19  ;;  %vm674_vm8 = vweird.f32 %v2363_v22  ;;  %vm660_vm11 = vmor %vm658_vm0, %vm659_vm7 }
 0x389   :  { %v655_v35 = vsub.f32 1.0, %v654_v23  ;;  %v684_v42 = vmul.f32 %v2365_v24, %v2750_v20  ;;  %vm689_vm10 = vweird.f32 %v2365_v24  ;;  %vm675_vm4 = vmor %vm673_vm2, %vm674_vm8 }
 0x38a   :  { %v641_v43 = vmul.f32 %v2359_v27, %v640_v33  ;;  %v670_v47 = vsub.f32 1.0, %v669_v34  ;;  %vm690_vm14 = vmor %vm688_vm13, %vm689_vm10 }
 0x38b   :  { %v656_v48 = vmul.f32 %v2361_v29, %v655_v35  ;;  %v685_v38 = vsub.f32 1.0, %v684_v42 }
 0x38c   :  { %v642_v50 = vadd.f32 %v2359_v27, %v641_v43  ;;  %v671_v39 = vmul.f32 %v2363_v22, %v670_v47 }
 0x38d   :  { %v657_v40 = vadd.f32 %v2361_v29, %v656_v48  ;;  %v686_v54 = vmul.f32 %v2365_v24, %v685_v38 }
 0x38e   :  { %v646_v55 = vsel %vm645_vm9, %v2359_v27, %v642_v50  ;;  %v672_v56 = vadd.f32 %v2363_v22, %v671_v39 }
 0x38f   :  { %v651_v57 = vsel %vm2753_vm15, %v650_v25, %v646_v55  ;;  %v661_v58 = vsel %vm660_vm11, %v2361_v29, %v657_v40  ;;  %v687_v60 = vadd.f32 %v2365_v24, %v686_v54  ;;  %vm693_vm15 = vcmp.eq.f32.partialorder %v692_v41, 8.507059e+37  ;;  %v897_v54 = vld [vmem:[%s3153_s18] sm:$0xf]  ;;  %s2369_s18 = smov 16  }
 0x390   :  { %v698_v61 = vmul.f32 %v651_v57, %v2617_v44  ;;  %v666_v62 = vsel %vm2757_vm5, %v665_v46, %v661_v58  ;;  %v676_v63 = vsel %vm675_vm4, %v2363_v22, %v672_v56 }
 0x391   :  { %v699_v2 = vmul.f32 %v666_v62, %v2622_v45  ;;  %v681_v3 = vsel %vm678_vm12, %v680_v59, %v676_v63  ;;  %v691_v4 = vsel %vm690_vm14, %v2365_v24, %v687_v60  ;;  %v724_v45 = vpop.f32.mrf.mxu0 }
 0x392   :  { %2229 = vmatpush.msk.msra.mxu0 %vm363_vm1, %v698_v61  ;;  %v700_v44 = vmul.f32 %v681_v3, %v2641_v52  ;;  %v696_v5 = vsel %vm693_vm15, %v695_v0, %v691_v4  ;;  %v764_v52 = vpop.f32.mrf.mxu2  ;;  %v944_v4 = vpop.permute.xlu1 %943  ;;  %vm966_vm15 = vcmask 31744  }
 0x393   :  { %2231 = vmatpush.msk.msra.mxu1 %vm363_vm1, %v699_v2  ;;  %v701_v6 = vmul.f32 %v696_v5, %v2636_v51  ;;  %2230 = vmatmul.msk.f32.vlgmr.msra.gmra.mxu0 %vm359_vm3, %v702_v1  ;;  %v886_v51 = vpop.permute.xlu0 %885 }
 0x394   :  { %2233 = vmatpush.msk.msra.mxu2 %vm363_vm1, %v700_v44  ;;  %2232 = vmatmul.msk.f32.vlgmr.msra.gmra.mxu1 %vm359_vm3, %v702_v1 }
 0x395   :  { %2235 = vmatpush.msk.msra.mxu3 %vm363_vm1, %v701_v6  ;;  %2234 = vmatmul.msk.f32.vlgmr.msra.gmra.mxu2 %vm359_vm3, %v702_v1  ;;  %vm3183_vm1 = vcmask 1043456  }
 0x396   :  { %2236 = vmatmul.msk.f32.vlgmr.msra.gmra.mxu3 %vm359_vm3, %v702_v1  ;;  %vm3184_vm3 = vmmov %vm3183_vm1 }
 0x397   :  { %vm3185_vm4 = vmmov %vm3183_vm1 }
 0x398   :  { %vm3186_vm0 = vmmov %vm3183_vm1 }
 0x399   :  { %vm3187_vm2 = vmmov %vm3186_vm0 }
 0x39a   :  { %vm3188_vm5 = vmmov %vm3186_vm0 }
 0x39b   :  { %vm3189_vm6 = vmmov %vm3186_vm0 }
 0x39c   :  { %vm3190_vm7 = vmmov %vm3186_vm0 }
 0x39d   :  { %vm3191_vm11 = vmmov %vm3186_vm0 }
 0x39e   :  { %vm3192_vm12 = vmmov %vm3186_vm0 }
 0x39f   :  { %vm3193_vm13 = vmmov %vm3186_vm0 }
 0x3a0   :  { %vm3194_vm14 = vmmov %vm3186_vm0 }
 0x410   :  { %v819_v9 = vpop.f32.mrf.mxu0 }
 0x411   :  { %v820_v10 = vadd.f32 %v819_v9, %v724_v45  ;;  %v839_v11 = vpop.f32.mrf.mxu1 }
 0x412   :  { %v840_v12 = vadd.f32 %v839_v11, %v744_v7  ;;  %v959_v11 = vld [vmem:[%s3154_s19] sm:$0xff]  ;;  %s2373_s19 = smov 127  }
 0x413   :  { %v888_v13 = vadd.f32 %v886_v51, %v820_v10 }
 0x414   :  { %v889_v14 = vadd.f32 %v886_v51, %v840_v12  ;;  %v960_v12 = vld [vmem:[%s3156_s20] sm:$0xff] }
 0x415   :  { %v892_v15 = vmax.f32 %v888_v13, 0.0 }
 0x416   :  { %v893_v16 = vmax.f32 %v889_v14, 0.0 }
 0x417   :  { %v898_v21 = vsel %vm3183_vm1, %v892_v15, 0.0 }
 0x418   :  { %v859_v17 = vpop.f32.mrf.mxu2  ;;  %v899_v26 = vsel %vm3184_vm3, %v893_v16, 0.0  ;;  %vm3195_vm3 = vmmov %vm3186_vm0 }
 0x419   :  { %v860_v18 = vadd.f32 %v859_v17, %v764_v52  ;;  %v879_v19 = vpop.f32.mrf.mxu3  ;;  %v900_v31 = vadd.f32 %v899_v26, %v898_v21 }
 0x41a   :  { %v880_v20 = vadd.f32 %v879_v19, %v784_v8 }
 0x41b   :  { %v890_v27 = vadd.f32 %v886_v51, %v860_v18  ;;  %v2245_v18 = vld [vmem:[%s3157_s2 + $0x4] sm:$0xf] }
 0x41c   :  { %v891_v28 = vadd.f32 %v886_v51, %v880_v20  ;;  %v2179_v51 = vld [vmem:[%s3155_s22] sm:$0xff]  ;;  %v1114_v19 = vperm.slane %v2245_v18, 2  ;;  %v1113_v21 = vperm.slane %v2245_v18, 1 }
 0x41d   :  { %v894_v29 = vmax.f32 %v890_v27, 0.0 }
 0x41e   :  { %v895_v30 = vmax.f32 %v891_v28, 0.0 }
 0x41f   :  { %v901_v22 = vsel %vm3185_vm4, %v894_v29, 0.0  ;;  %vm3196_vm4 = vmmov %vm3186_vm0 }
 0x420   :  { %v902_v32 = vadd.f32 %v901_v22, %v900_v31  ;;  %v903_v23 = vsel %vm3186_vm0, %v895_v30, 0.0  ;;  %v2246_v31 = vld [vmem:[%s3158_s21 + $0x8] sm:$0xff] }
 0x422   :  { %v904_v24 = vadd.f32 %v903_v23, %v902_v32  ;;  %v1112_v32 = vperm.slane %v2245_v18, 0  ;;  %v1115_v23 = vperm.slane %v2245_v18, 3 }
 0x424   :  { %905 = vadd.xlane.f32.xlu0 %v904_v24 }
 0x497   :  { %v906_v33 = vpop.xlane.xlu0 %905 }
 0x498   :  { %v907_v25 = vmul.f32 0.001953125, %v906_v33 }
 0x49a   :  { %v908_v34 = vsub.f32 %v892_v15, %v907_v25  ;;  %v909_v35 = vsub.f32 %v893_v16, %v907_v25  ;;  %v910_v36 = vsub.f32 %v894_v29, %v907_v25  ;;  %v911_v37 = vsub.f32 %v895_v30, %v907_v25 }
 0x49b   :  { %v1074_v15 = vlaneseq }
 0x49c   :  { %v912_v42 = vmul.f32 %v908_v34, %v908_v34  ;;  %v913_v43 = vmul.f32 %v909_v35, %v909_v35  ;;  %v914_v46 = vmul.f32 %v910_v36, %v910_v36  ;;  %v915_v47 = vmul.f32 %v911_v37, %v911_v37 }
 0x49d   :  { %v2865_v17 = vand.u32 127, %v1074_v15 }
 0x49e   :  { %v916_v48 = vsel %vm3187_vm2, %v912_v42, 0.0  ;;  %v917_v49 = vsel %vm3188_vm5, %v913_v43, 0.0  ;;  %v919_v50 = vsel %vm3189_vm6, %v914_v46, 0.0  ;;  %v921_v53 = vsel %vm3190_vm7, %v915_v47, 0.0  ;;  %v1081_v42 = vld [vmem:[%s3157_s2] sm:$0xf]  ;;  %vm3197_vm2 = vmmov %vm3186_vm0 }
 0x49f   :  { %v918_v38 = vadd.f32 %v917_v49, %v916_v48  ;;  %vm1104_vm1 = vcmp.lt.s32.totalorder %v2865_v17, 16  ;;  %v2263_v43 = vld [vmem:[%s3157_s2 + $0x8] sm:$0xf]  ;;  %vm1324_vm5 = vcmp.lt.s32.totalorder %v2865_v17, 15  ;;  %vm1076_vm6 = vcmp.lt.s32.totalorder %v2865_v17, 17  ;;  %vm3198_vm7 = vmmov %vm3186_vm0 }
 0x4a0   :  { %v1085_v46 = vperm.slane %v1081_v42, 2  ;;  %v1086_v47 = vperm.slane %v1081_v42, 3  ;;  %v1334_v48 = vperm.slane %v2263_v43, 2 }
 0x4a1   :  { %v920_v39 = vadd.f32 %v919_v50, %v918_v38 }
 0x4a3   :  { %v922_v40 = vadd.f32 %v921_v53, %v920_v39 }
 0x4a5   :  { %923 = vadd.xlane.f32.xlu2 %v922_v40 }
 0x4bd   :  { %952 = vperm.xlu2 %2342, %v897_v54  }
 0x518   :  { %v924_v41 = vpop.xlane.xlu2 %923 }
 0x519   :  { %v925_v55 = vmul.f32 0.001953125, %v924_v41 }
 0x51b   :  { %v926_v56 = vadd.f32 1e-05, %v925_v55 }
 0x51d   :  { %2366 = vrsqrt.f32 %v926_v56  ;;  %vm933_vm9 = vweird.f32 %v926_v56 }
 0x520   :  { %v953_v7 = vpop.permute.xlu2 %952 }
 0x523   :  { %v2367_v57 = vpop.eup %2366 }
 0x524   :  { %v928_v58 = vmul.f32 %v2367_v57, %v926_v56  ;;  %vm934_vm8 = vweird.f32 %v2367_v57  ;;  %v1095_v56 = vld [vmem:[%s3158_s21] sm:$0xff] }
 0x525   :  { %vm935_vm10 = vmor %vm933_vm9, %vm934_vm8 }
 0x526   :  { %v929_v59 = vmul.f32 %v2367_v57, %v928_v58  ;;  %vm3199_vm8 = vmmov %vm3186_vm0  ;;  %v1084_v58 = vperm.slane %v1081_v42, 1 }
 0x527   :  { %vm3200_vm9 = vmmov %vm3186_vm0 }
 0x528   :  { %v930_v60 = vmul.f32 0.5, %v929_v59  ;;  %v2273_v59 = vld [vmem:[%s3157_s2 + $0xc] sm:$0xf] }
 0x52a   :  { %v931_v61 = vsub.f32 1.5, %v930_v60 }
 0x52c   :  { %v932_v62 = vmul.f32 %v2367_v57, %v931_v61  ;;  %v1333_v61 = vperm.slane %v2263_v43, 1 }
 0x52e   :  { %v936_v63 = vsel %vm935_vm10, %v2367_v57, %v932_v62  ;;  %v1083_v57 = vperm.slane %v1081_v42, 0  ;;  %vm1453_vm10 = vcmp.lt.s32.totalorder %v2865_v17, 1 }
 0x52f   :  { %v937_v0 = vmul.f32 %v936_v63, %v908_v34  ;;  %v938_v1 = vmul.f32 %v936_v63, %v909_v35  ;;  %v939_v2 = vmul.f32 %v936_v63, %v910_v36  ;;  %v940_v3 = vmul.f32 %v936_v63, %v911_v37 }
 0x531   :  { %v946_v44 = vmul.f32 %v944_v4, %v937_v0  ;;  %v947_v5 = vmul.f32 %v944_v4, %v938_v1  ;;  %v948_v6 = vmul.f32 %v944_v4, %v939_v2  ;;  %v949_v45 = vmul.f32 %v944_v4, %v940_v3 }
 0x532   :  { %v1462_v2 = vperm.slane %v2273_v59, 1 }
 0x533   :  { %v2800_v52 = vadd.f32 %v953_v7, %v946_v44  ;;  %v2802_v8 = vadd.f32 %v953_v7, %v947_v5  ;;  %v2804_v9 = vadd.f32 %v953_v7, %v948_v6  ;;  %v2806_v10 = vadd.f32 %v953_v7, %v949_v45  ;;  %v2264_v6 = vld [vmem:[%s3158_s21 + $0x10] sm:$0xff] }
 0x535   :  { %2243 = vmatpush.msk.msrb.mxu3 %vm3191_vm11, %v2806_v10  ;;  %1100 = vrot.lane.b32.xlu2 %v2804_v9, %s2369_s18  ;;  %vm3201_vm11 = vmmov %vm3186_vm0 }
 0x536   :  { %2241 = vmatpush.msk.msrb.mxu2 %vm3192_vm12, %v2804_v9  ;;  %1098 = vrot.lane.b32.xlu1 %v2802_v8, %s2369_s18  ;;  %vm3202_vm12 = vmmov %vm3186_vm0 }
 0x537   :  { %2239 = vmatpush.msk.msrb.mxu1 %vm3193_vm13, %v2802_v8  ;;  %1096 = vrot.lane.b32.xlu0 %v2800_v52, %s2369_s18  ;;  %vm3203_vm13 = vmmov %vm3186_vm0 }
 0x538   :  { %2237 = vmatpush.msk.msrb.mxu0 %vm3194_vm14, %v2800_v52  ;;  %2242 = vmatmul.msk.f32.vlgmr.msrb.gmra.mxu2 %vm966_vm15, %v959_v11  ;;  %vm3204_vm14 = vmmov %vm3186_vm0 }
 0x539   :  { %2244 = vmatmul.msk.f32.vlgmr.msrb.gmra.mxu3 %vm966_vm15, %v959_v11  ;;  %2238 = vmatmul.msk.f32.vlgmr.msrb.gmra.mxu0 %vm966_vm15, %v959_v11 }
 0x53a   :  { %2240 = vmatmul.msk.f32.vlgmr.msrb.gmra.mxu1 %vm966_vm15, %v959_v11  ;;  %v1332_v11 = vperm.slane %v2263_v43, 0 }
 0x53d   :  { %1068 = vrot.lane.b32.xlu2 %v2802_v8, %s2370_s13 }
 0x53e   :  { %1102 = vrot.lane.b32.xlu1 %v2806_v10, %s2369_s18 }
 0x53f   :  { %1320 = vrot.lane.b32.xlu0 %v2804_v9, %s2371_s28 }
 0x545   :  { %1072 = vrot.lane.b32.xlu2 %v2806_v10, %s2370_s13 }
 0x546   :  { %1070 = vrot.lane.b32.xlu1 %v2804_v9, %s2370_s13 }
 0x547   :  { %1447 = vrot.lane.b32.xlu0 %v2802_v8, %s2372_s0 }
 0x54d   :  { %1318 = vrot.lane.b32.xlu2 %v2802_v8, %s2371_s28 }
 0x54e   :  { %1066 = vrot.lane.b32.xlu1 %v2800_v52, %s2370_s13 }
 0x54f   :  { %1445 = vrot.lane.b32.xlu0 %v2800_v52, %s2372_s0 }
 0x555   :  { %1316 = vrot.lane.b32.xlu2 %v2800_v52, %s2371_s28 }
 0x556   :  { %1322 = vrot.lane.b32.xlu1 %v2806_v10, %s2371_s28 }
 0x557   :  { %1669 = vrot.lane.b32.xlu0 %v2806_v10, %s2373_s19 }
 0x55d   :  { %1451 = vrot.lane.b32.xlu2 %v2806_v10, %s2372_s0 }
 0x55e   :  { %1449 = vrot.lane.b32.xlu1 %v2804_v9, %s2372_s0 }
 0x55f   :  { %1796 = vrot.lane.b32.xlu0 %v2804_v9, %s2374_s5 }
 0x565   :  { %1667 = vrot.lane.b32.xlu2 %v2804_v9, %s2373_s19 }
 0x566   :  { %1663 = vrot.lane.b32.xlu1 %v2800_v52, %s2373_s19 }
 0x567   :  { %1921 = vrot.lane.b32.xlu0 %v2800_v52, %s2375_s30 }
 0x56d   :  { %1792 = vrot.lane.b32.xlu2 %v2800_v52, %s2374_s5 }
 0x56e   :  { %1665 = vrot.lane.b32.xlu1 %v2802_v8, %s2373_s19 }
 0x56f   :  { %1923 = vrot.lane.b32.xlu0 %v2802_v8, %s2375_s30 }
 0x575   :  { %1794 = vrot.lane.b32.xlu2 %v2802_v8, %s2374_s5 }
 0x576   :  { %1798 = vrot.lane.b32.xlu1 %v2806_v10, %s2374_s5 }
 0x577   :  { %2056 = vrot.lane.b32.xlu0 %v2806_v10, %s2376_s25 }
 0x57d   :  { %1927 = vrot.lane.b32.xlu2 %v2806_v10, %s2375_s30 }
 0x57e   :  { %1925 = vrot.lane.b32.xlu1 %v2804_v9, %s2375_s30 }
 0x57f   :  { %2182 = vperm.xlu0 %2341, %v2179_v51   ;;  %v1335_v51 = vperm.slane %v2263_v43, 3 }
 0x585   :  { %2054 = vrot.lane.b32.xlu2 %v2804_v9, %s2376_s25 }
 0x586   :  { %2050 = vrot.lane.b32.xlu1 %v2800_v52, %s2376_s25 }
 0x58d   :  { %963 = vperm.xlu2 %2342, %v960_v12  }
 0x58e   :  { %2052 = vrot.lane.b32.xlu1 %v2802_v8, %s2376_s25 }
 0x58f   :  { %v1101_v13 = vpop.permute.xlu2 %1100 }
 0x597   :  { %v2861_v14 = vpop.permute.xlu2 %1068 }
 0x59f   :  { %v2863_v16 = vpop.permute.xlu2 %1072 }
 0x5a7   :  { %v1319_v20 = vpop.permute.xlu2 %1318 }
 0x5a8   :  { %v1099_v26 = vpop.permute.xlu1 %1098 }
 0x5a9   :  { %v1106_v27 = vsel %vm1104_vm1, %v1099_v26, %v1101_v13  ;;  %v1097_v28 = vpop.permute.xlu0 %1096 }
 0x5aa   :  { %v1122_v29 = vmul.f32 %v1114_v19, %v1106_v27  ;;  %v1107_v30 = vsel %vm1104_vm1, %v1097_v28, %v1099_v26  ;;  %v1463_v27 = vperm.slane %v2273_v59, 2 }
 0x5ab   :  { %v1121_v22 = vmul.f32 %v1113_v21, %v1107_v30 }
 0x5ac   :  { %2251 = vmatpush.msk.msra.mxu2 %vm3195_vm3, %v1122_v29  ;;  %vm3206_vm3 = vmmov %vm3186_vm0  ;;  %v2292_v29 = vld [vmem:[%s3157_s2 + $0x14] sm:$0xf] }
 0x5ad   :  { %2249 = vmatpush.msk.msra.mxu1 %vm3196_vm4, %v1121_v22  ;;  %2252 = vmatmul.msk.f32.vlgmr.msra.gmra.mxu2 %vm966_vm15, %v2246_v31  ;;  %vm3207_vm4 = vmmov %vm3186_vm0 }
 0x5ae   :  { %2250 = vmatmul.msk.f32.vlgmr.msra.gmra.mxu1 %vm966_vm15, %v2246_v31 }
 0x5af   :  { %v2882_v24 = vpop.permute.xlu2 %1316 }
 0x5b0   :  { %v1103_v33 = vpop.permute.xlu1 %1102  ;;  %v1327_v63 = vsel %vm1324_vm5, %v2882_v24, %v1319_v20 }
 0x5b1   :  { %v1105_v25 = vsel %vm1104_vm1, %v1101_v13, %v1103_v33  ;;  %v1108_v34 = vsel %vm1104_vm1, %v1103_v33, %v1097_v28  ;;  %v1321_v35 = vpop.permute.xlu0 %1320  ;;  %v1341_v45 = vmul.f32 %v1333_v61, %v1327_v63  ;;  %v1461_v13 = vperm.slane %v2273_v59, 0  ;;  %vm3205_vm1 = vmmov %vm3186_vm0 }
 0x5b2   :  { %v1120_v36 = vmul.f32 %v1112_v32, %v1108_v34  ;;  %v1123_v37 = vmul.f32 %v1115_v23, %v1105_v25  ;;  %v1326_v38 = vsel %vm1324_vm5, %v1319_v20, %v1321_v35  ;;  %v1464_v28 = vperm.slane %v2273_v59, 3 }
 0x5b3   :  { %v1342_v55 = vmul.f32 %v1334_v48, %v1326_v38  ;;  %v1680_v48 = vperm.slane %v2292_v29, 1 }
 0x5b4   :  { %2247 = vmatpush.msk.msra.mxu0 %vm3186_vm0, %v1120_v36  ;;  %2253 = vmatpush.msk.msra.mxu3 %vm3197_vm2, %v1123_v37  ;;  %vm3208_vm2 = vmmov %vm3186_vm0 }
 0x5b5   :  { %2248 = vmatmul.msk.f32.vlgmr.msra.gmra.mxu0 %vm966_vm15, %v2246_v31  ;;  %2254 = vmatmul.msk.f32.vlgmr.msra.gmra.mxu3 %vm966_vm15, %v2246_v31 }
 0x5b7   :  { %v2900_v49 = vpop.permute.xlu2 %1451 }
 0x5b8   :  { %v1071_v50 = vpop.permute.xlu1 %1070 }
 0x5b9   :  { %v1077_v39 = vsel %vm1076_vm6, %v1071_v50, %v2863_v16  ;;  %v1078_v53 = vsel %vm1076_vm6, %v2861_v14, %v1071_v50  ;;  %v2910_v40 = vpop.permute.xlu0 %1447 }
 0x5ba   :  { %v1093_v54 = vmul.f32 %v1085_v46, %v1078_v53  ;;  %v1094_v41 = vmul.f32 %v1086_v47, %v1077_v39  ;;  %v2283_v47 = vld [vmem:[%s3158_s21 + $0x20] sm:$0xff]  ;;  %v3018_v39 = vld [vmem:[%s3157_s2 + $0x1c] sm:$0xf] }
 0x5bb   :  { %v1039_v63 = vpop.f32.mrf.mxu2 }
 0x5bc   :  { %2259 = vmatpush.msk.msrb.mxu2 %vm3198_vm7, %v1093_v54  ;;  %2261 = vmatpush.msk.msrb.mxu3 %vm3199_vm8, %v1094_v41  ;;  %vm3210_vm7 = vmmov %vm3186_vm0  ;;  %v1937_v41 = vperm.slane %v3018_v39, 0 }
 0x5bd   :  { %2262 = vmatmul.msk.f32.vlgmr.msrb.gmra.mxu3 %vm966_vm15, %v1095_v56  ;;  %2260 = vmatmul.msk.f32.vlgmr.msrb.gmra.mxu2 %vm966_vm15, %v1095_v56  ;;  %vm3211_vm8 = vmmov %vm3186_vm0 }
 0x5be   :  { %2269 = vmatpush.msk.msra.mxu2 %vm3200_vm9, %v1342_v55  ;;  %vm3212_vm9 = vmmov %vm3186_vm0 }
 0x5bf   :  { %v2923_v60 = vpop.permute.xlu2 %1667 }
 0x5c0   :  { %v1067_v62 = vpop.permute.xlu1 %1066 }
 0x5c1   :  { %v1079_v0 = vsel %vm1076_vm6, %v1067_v62, %v2861_v14  ;;  %v1080_v1 = vsel %vm1076_vm6, %v2863_v16, %v1067_v62  ;;  %v1446_v3 = vpop.permute.xlu0 %1445  ;;  %vm3209_vm6 = vmmov %vm3186_vm0  ;;  %v1019_v62 = vpop.f32.mrf.mxu1 }
 0x5c2   :  { %v1091_v4 = vmul.f32 %v1083_v57, %v1080_v1  ;;  %v1092_v44 = vmul.f32 %v1084_v58, %v1079_v0  ;;  %v1456_v5 = vsel %vm1453_vm10, %v1446_v3, %v2910_v40  ;;  %v1457_v15 = vsel %vm1453_vm10, %v2900_v49, %v1446_v3  ;;  %v999_v3 = vpop.f32.mrf.mxu0 }
 0x5c3   :  { %v1470_v7 = vmul.f32 %v1462_v2, %v1456_v5  ;;  %v1469_v26 = vmul.f32 %v1461_v13, %v1457_v15  ;;  %v1059_v2 = vpop.f32.mrf.mxu3 }
 0x5c4   :  { %2255 = vmatpush.msk.msrb.mxu0 %vm3201_vm11, %v1091_v4  ;;  %2257 = vmatpush.msk.msrb.mxu1 %vm3202_vm12, %v1092_v44  ;;  %vm3214_vm11 = vmmov %vm3186_vm0  ;;  %vm1800_vm12 = vcmp.lt.s32.totalorder %v2865_v17, 113 }
 0x5c5   :  { %2256 = vmatmul.msk.f32.vlgmr.msrb.gmra.mxu0 %vm966_vm15, %v1095_v56  ;;  %2258 = vmatmul.msk.f32.vlgmr.msrb.gmra.mxu1 %vm966_vm15, %v1095_v56 }
 0x5c6   :  { %2267 = vmatpush.msk.msra.mxu1 %vm3203_vm13, %v1341_v45  ;;  %2270 = vmatmul.msk.f32.vlgmr.msra.gmra.mxu2 %vm966_vm15, %v2264_v6  ;;  %vm1929_vm13 = vcmp.lt.s32.totalorder %v2865_v17, 112 }
 0x5c7   :  { %v2948_v12 = vpop.permute.xlu2 %1792 }
 0x5c8   :  { %2277 = vmatpush.msk.msrb.mxu1 %vm3204_vm14, %v1470_v7  ;;  %v1323_v14 = vpop.permute.xlu1 %1322  ;;  %vm3215_vm14 = vmmov %vm3186_vm0 }
 0x5c9   :  { %v1325_v16 = vsel %vm1324_vm5, %v1321_v35, %v1323_v14  ;;  %v1328_v18 = vsel %vm1324_vm5, %v1323_v14, %v2882_v24  ;;  %v1670_v19 = vpop.permute.xlu0 %1669  ;;  %vm1671_vm5 = vcmp.lt.s32.totalorder %v2865_v17, 127  ;;  %v1681_v24 = vperm.slane %v2292_v29, 2 }
 0x5ca   :  { %v1340_v20 = vmul.f32 %v1332_v11, %v1328_v18  ;;  %v1343_v21 = vmul.f32 %v1335_v51, %v1325_v16  ;;  %v1672_v25 = vsel %vm1671_vm5, %v2923_v60, %v1670_v19  ;;  %v1682_v35 = vperm.slane %v2292_v29, 3 }
 0x5cb   :  { %v1689_v34 = vmul.f32 %v1681_v24, %v1672_v25  ;;  %v1940_v14 = vperm.slane %v3018_v39, 3 }
 0x5cc   :  { %2265 = vmatpush.msk.msra.mxu0 %vm3205_vm1, %v1340_v20  ;;  %2271 = vmatpush.msk.msra.mxu3 %vm3206_vm3, %v1343_v21  ;;  %vm3216_vm1 = vmmov %vm3186_vm0 }
 0x5cd   :  { %2266 = vmatmul.msk.f32.vlgmr.msra.gmra.mxu0 %vm966_vm15, %v2264_v6  ;;  %2268 = vmatmul.msk.f32.vlgmr.msra.gmra.mxu1 %vm966_vm15, %v2264_v6  ;;  %vm3217_vm3 = vmmov %vm3186_vm0 }
 0x5ce   :  { %2272 = vmatmul.msk.f32.vlgmr.msra.gmra.mxu3 %vm966_vm15, %v2264_v6  ;;  %2275 = vmatpush.msk.msrb.mxu0 %vm3207_vm4, %v1469_v26  ;;  %vm3218_vm4 = vmmov %vm3186_vm0  ;;  %v2303_v26 = vld [vmem:[%s3158_s21 + $0x30] sm:$0xff] }
 0x5cf   :  { %2286 = vmatpush.msk.msra.mxu1 %vm3186_vm0, %v2802_v8  ;;  %v1795_v30 = vpop.permute.xlu2 %1794 }
 0x5d0   :  { %2284 = vmatpush.msk.msra.mxu0 %vm3208_vm2, %v2800_v52  ;;  %v1450_v31 = vpop.permute.xlu1 %1449  ;;  %v2274_v52 = vld [vmem:[%s3158_s21 + $0x18] sm:$0xff]  ;;  %v1803_v56 = vsel %vm1800_vm12, %v2948_v12, %v1795_v30  ;;  %vm3219_vm2 = vmmov %vm3186_vm0 }
 0x5d1   :  { %v1454_v22 = vsel %vm1453_vm10, %v1450_v31, %v2900_v49  ;;  %v1455_v32 = vsel %vm1453_vm10, %v2910_v40, %v1450_v31  ;;  %v2978_v23 = vpop.permute.xlu0 %1796  ;;  %vm3213_vm10 = vmmov %vm3186_vm0 }
 0x5d2   :  { %v1471_v33 = vmul.f32 %v1463_v27, %v1455_v32  ;;  %v1472_v8 = vmul.f32 %v1464_v28, %v1454_v22  ;;  %v1802_v57 = vsel %vm1800_vm12, %v1795_v30, %v2978_v23  ;;  %v1938_v22 = vperm.slane %v3018_v39, 1 }
 0x5d3   :  { %v1939_v32 = vperm.slane %v3018_v39, 2 }
 0x5d4   :  { %2279 = vmatpush.msk.msrb.mxu2 %vm3209_vm6, %v1471_v33  ;;  %2281 = vmatpush.msk.msrb.mxu3 %vm3210_vm7, %v1472_v8  ;;  %vm3220_vm6 = vmmov %vm3186_vm0 }
 0x5d5   :  { %2276 = vmatmul.msk.f32.vlgmr.msrb.gmra.mxu0 %vm966_vm15, %v2274_v52  ;;  %2278 = vmatmul.msk.f32.vlgmr.msrb.gmra.mxu1 %vm966_vm15, %v2274_v52  ;;  %vm3221_vm7 = vmmov %vm3186_vm0 }
 0x5d6   :  { %2280 = vmatmul.msk.f32.vlgmr.msrb.gmra.mxu2 %vm966_vm15, %v2274_v52  ;;  %2282 = vmatmul.msk.f32.vlgmr.msrb.gmra.mxu3 %vm966_vm15, %v2274_v52 }
 0x5d7   :  { %2288 = vmatpush.msk.msra.mxu2 %vm3211_vm8, %v2804_v9  ;;  %2290 = vmatpush.msk.msra.mxu3 %vm3212_vm9, %v2806_v10  ;;  %v2996_v36 = vpop.permute.xlu2 %1927  ;;  %v2302_v9 = vld [vmem:[%s3157_s2 + $0x18] sm:$0xf]  ;;  %v1679_v10 = vperm.slane %v2292_v29, 0  ;;  %vm3222_vm8 = vmmov %vm3186_vm0 }
 0x5d8   :  { %v1664_v37 = vpop.permute.xlu1 %1663  ;;  %v1808_v38 = vperm.slane %v2302_v9, 0  ;;  %v1809_v50 = vperm.slane %v2302_v9, 1  ;;  %v1810_v44 = vperm.slane %v2302_v9, 2  ;;  %v1811_v6 = vperm.slane %v2302_v9, 3  ;;  %vm3223_vm9 = vmmov %vm3186_vm0 }
 0x5d9   :  { %2298 = vmatpush.msk.msrb.mxu2 %vm3213_vm10, %v1689_v34  ;;  %v1675_v42 = vsel %vm1671_vm5, %v1670_v19, %v1664_v37  ;;  %v1922_v43 = vpop.permute.xlu0 %1921  ;;  %vm3224_vm10 = vmmov %vm3186_vm0 }
 0x5da   :  { %v1690_v46 = vmul.f32 %v1682_v35, %v1675_v42  ;;  %v1816_v0 = vmul.f32 %v1808_v38, %v1803_v56  ;;  %v1817_v1 = vmul.f32 %v1809_v50, %v1802_v57  ;;  %v1933_v27 = vsel %vm1929_vm13, %v2996_v36, %v1922_v43  ;;  %v2313_v35 = vld [vmem:[%s3158_s21 + $0x38] sm:$0xff] }
 0x5db   :  { %v1948_v31 = vmul.f32 %v1940_v14, %v1933_v27 }
 0x5dc   :  { %2300 = vmatpush.msk.msrb.mxu3 %vm3214_vm11, %v1690_v46  ;;  %vm3225_vm11 = vmmov %vm3186_vm0 }
 0x5dd   :  { %2285 = vmatmul.msk.f32.vlgmr.msra.gmra.mxu0 %vm966_vm15, %v2283_v47  ;;  %2287 = vmatmul.msk.f32.vlgmr.msra.gmra.mxu1 %vm966_vm15, %v2283_v47 }
 0x5de   :  { %2289 = vmatmul.msk.f32.vlgmr.msra.gmra.mxu2 %vm966_vm15, %v2283_v47  ;;  %2291 = vmatmul.msk.f32.vlgmr.msra.gmra.mxu3 %vm966_vm15, %v2283_v47  ;;  %v2323_v47 = vld [vmem:[%s3158_s21 + $0x40] sm:$0xff] }
 0x5df   :  { %v3013_v49 = vpop.permute.xlu2 %2054 }
 0x5e0   :  { %v1666_v53 = vpop.permute.xlu1 %1665 }
 0x5e1   :  { %v1673_v40 = vsel %vm1671_vm5, %v1666_v53, %v2923_v60  ;;  %v1674_v54 = vsel %vm1671_vm5, %v1664_v37, %v1666_v53  ;;  %v3027_v55 = vpop.permute.xlu0 %1923  ;;  %v2293_v60 = vld [vmem:[%s3158_s21 + $0x28] sm:$0xff]  ;;  %vm2058_vm5 = vcmp.lt.s32.totalorder %v2865_v17, 111 }
 0x5e2   :  { %v1687_v58 = vmul.f32 %v1679_v10, %v1674_v54  ;;  %v1688_v59 = vmul.f32 %v1680_v48, %v1673_v40  ;;  %v1932_v61 = vsel %vm1929_vm13, %v1922_v43, %v3027_v55 }
 0x5e3   :  { %v1945_v4 = vmul.f32 %v1937_v41, %v1932_v61 }
 0x5e4   :  { %2294 = vmatpush.msk.msrb.mxu0 %vm3215_vm14, %v1687_v58  ;;  %2296 = vmatpush.msk.msrb.mxu1 %vm3216_vm1, %v1688_v59 }
 0x5e5   :  { %2295 = vmatmul.msk.f32.vlgmr.msrb.gmra.mxu0 %vm966_vm15, %v2293_v60  ;;  %2297 = vmatmul.msk.f32.vlgmr.msrb.gmra.mxu1 %vm966_vm15, %v2293_v60 }
 0x5e6   :  { %2299 = vmatmul.msk.f32.vlgmr.msrb.gmra.mxu2 %vm966_vm15, %v2293_v60  ;;  %2301 = vmatmul.msk.f32.vlgmr.msrb.gmra.mxu3 %vm966_vm15, %v2293_v60 }
 0x5e7   :  { %2304 = vmatpush.msk.msra.mxu0 %vm3217_vm3, %v1816_v0  ;;  %2306 = vmatpush.msk.msra.mxu1 %vm3218_vm4, %v1817_v1  ;;  %v964_v5 = vpop.permute.xlu2 %963 }
 0x5e8   :  { %v1020_v45 = vadd.f32 %v1019_v62, %v964_v5  ;;  %v1040_v7 = vadd.f32 %v1039_v63, %v964_v5  ;;  %v1060_v11 = vadd.f32 %v1059_v2, %v964_v5  ;;  %v1799_v51 = vpop.permute.xlu1 %1798  ;;  %v1000_v13 = vadd.f32 %v999_v3, %v964_v5 }
 0x5e9   :  { %2314 = vmatpush.msk.msrb.mxu0 %vm3186_vm0, %v1945_v4  ;;  %v1801_v15 = vsel %vm1800_vm12, %v2978_v23, %v1799_v51  ;;  %v1804_v16 = vsel %vm1800_vm12, %v1799_v51, %v2948_v12  ;;  %v2322_v12 = vld [vmem:[%s3157_s2 + $0x20] sm:$0xf]  ;;  %v2057_v30 = vpop.permute.xlu0 %2056  ;;  %vm3226_vm12 = vmmov %vm3186_vm0 }
 0x5ea   :  { %v1063_v18 = vmax.f32 %v1020_v45, 0.0  ;;  %v1064_v19 = vmax.f32 %v1040_v7, 0.0  ;;  %v1065_v20 = vmax.f32 %v1060_v11, 0.0  ;;  %v1818_v21 = vmul.f32 %v1810_v44, %v1801_v15 }
 0x5eb   :  { %v1819_v28 = vmul.f32 %v1811_v6, %v1804_v16  ;;  %v1062_v29 = vmax.f32 %v1000_v13, 0.0  ;;  %v2068_v23 = vperm.slane %v2322_v12, 2  ;;  %v2059_v24 = vsel %vm2058_vm5, %v3013_v49, %v2057_v30 }
 0x5ec   :  { %2194 = vst [vmem:[%s3159_s23 + $0x8] sm:$0xff] %v1063_v18  ;;  %2308 = vmatpush.msk.msra.mxu2 %vm3219_vm2, %v1818_v21  ;;  %v2066_v9 = vperm.slane %v2322_v12, 0  ;;  %v2067_v10 = vperm.slane %v2322_v12, 1 }
 0x5ed   :  { %2195 = vst [vmem:[%s3159_s23 + $0x10] sm:$0xff] %v1064_v19  ;;  %2310 = vmatpush.msk.msra.mxu3 %vm3220_vm6, %v1819_v28  ;;  %2305 = vmatmul.msk.f32.vlgmr.msra.gmra.mxu0 %vm966_vm15, %v2303_v26  ;;  %v2076_v37 = vmul.f32 %v2068_v23, %v2059_v24 }
 0x5ee   :  { %2196 = vst [vmem:[%s3159_s23 + $0x18] sm:$0xff] %v1065_v20  ;;  %2307 = vmatmul.msk.f32.vlgmr.msra.gmra.mxu1 %vm966_vm15, %v2303_v26  ;;  %2309 = vmatmul.msk.f32.vlgmr.msra.gmra.mxu2 %vm966_vm15, %v2303_v26 }
 0x5ef   :  { %2193 = vst [vmem:[%s3159_s23] sm:$0xff] %v1062_v29  ;;  %2311 = vmatmul.msk.f32.vlgmr.msra.gmra.mxu3 %vm966_vm15, %v2303_v26 }
 0x5f0   :  { %2320 = vmatpush.msk.msrb.mxu3 %vm3221_vm7, %v1948_v31  ;;  %v1926_v33 = vpop.permute.xlu1 %1925 }
 0x5f1   :  { %v1930_v8 = vsel %vm1929_vm13, %v1926_v33, %v2996_v36  ;;  %v1931_v52 = vsel %vm1929_vm13, %v3027_v55, %v1926_v33  ;;  %v2069_v36 = vperm.slane %v2322_v12, 3  ;;  %vm3227_vm13 = vmmov %vm3186_vm0 }
 0x5f2   :  { %v1946_v25 = vmul.f32 %v1938_v22, %v1931_v52  ;;  %v1947_v34 = vmul.f32 %v1939_v32, %v1930_v8 }
 0x5f4   :  { %2316 = vmatpush.msk.msrb.mxu1 %vm3222_vm8, %v1946_v25  ;;  %2318 = vmatpush.msk.msrb.mxu2 %vm3223_vm9, %v1947_v34 }
 0x5f5   :  { %2315 = vmatmul.msk.f32.vlgmr.msrb.gmra.mxu0 %vm966_vm15, %v2313_v35 }
 0x5f6   :  { %2328 = vmatpush.msk.msra.mxu2 %vm3224_vm10, %v2076_v37  ;;  %2317 = vmatmul.msk.f32.vlgmr.msrb.gmra.mxu1 %vm966_vm15, %v2313_v35 }
 0x5f7   :  { %2319 = vmatmul.msk.f32.vlgmr.msrb.gmra.mxu2 %vm966_vm15, %v2313_v35  ;;  %2321 = vmatmul.msk.f32.vlgmr.msrb.gmra.mxu3 %vm966_vm15, %v2313_v35 }
 0x5f8   :  { %v2051_v42 = vpop.permute.xlu1 %2050 }
 0x5f9   :  { %v2062_v43 = vsel %vm2058_vm5, %v2057_v30, %v2051_v42 }
 0x5fa   :  { %v2077_v46 = vmul.f32 %v2069_v36, %v2062_v43 }
 0x5fc   :  { %2330 = vmatpush.msk.msra.mxu3 %vm3225_vm11, %v2077_v46 }
 0x5ff   :  { %2329 = vmatmul.msk.f32.vlgmr.msra.gmra.mxu2 %vm966_vm15, %v2323_v47  ;;  %2331 = vmatmul.msk.f32.vlgmr.msra.gmra.mxu3 %vm966_vm15, %v2323_v47 }
 0x600   :  { %v2053_v48 = vpop.permute.xlu1 %2052 }
 0x601   :  { %v2060_v38 = vsel %vm2058_vm5, %v2053_v48, %v3013_v49  ;;  %v2061_v50 = vsel %vm2058_vm5, %v2051_v42, %v2053_v48 }
 0x602   :  { %v2074_v39 = vmul.f32 %v2066_v9, %v2061_v50  ;;  %v2075_v53 = vmul.f32 %v2067_v10, %v2060_v38 }
 0x604   :  { %2324 = vmatpush.msk.msra.mxu0 %vm3226_vm12, %v2074_v39  ;;  %2326 = vmatpush.msk.msra.mxu1 %vm3227_vm13, %v2075_v53 }
 0x605   :  { %2325 = vmatmul.msk.f32.vlgmr.msra.gmra.mxu0 %vm966_vm15, %v2323_v47  ;;  %2327 = vmatmul.msk.f32.vlgmr.msra.gmra.mxu1 %vm966_vm15, %v2323_v47 }
 0x62b   :  { %v1178_v54 = vpop.f32.mrf.mxu1 }
 0x630   :  { %v1198_v41 = vpop.f32.mrf.mxu2 }
 0x632   :  { %v1158_v40 = vpop.f32.mrf.mxu0 }
 0x638   :  { %v1218_v55 = vpop.f32.mrf.mxu3 }
 0x640   :  { %v1293_v49 = vpop.f32.mrf.mxu2  ;;  %v1313_v58 = vpop.f32.mrf.mxu3 }
 0x641   :  { %v1294_v15 = vadd.f32 %v1293_v49, %v1198_v41  ;;  %v1314_v18 = vadd.f32 %v1313_v58, %v1218_v55 }
 0x642   :  { %v1253_v56 = vpop.f32.mrf.mxu0  ;;  %v1273_v57 = vpop.f32.mrf.mxu1 }
 0x643   :  { %v1254_v16 = vadd.f32 %v1253_v56, %v1158_v40  ;;  %v1274_v19 = vadd.f32 %v1273_v57, %v1178_v54  ;;  %v2183_v40 = vpop.permute.xlu0 %2182 }
 0x649   :  { %v1418_v60 = vpop.f32.mrf.mxu2 }
 0x64a   :  { %v1378_v17 = vpop.f32.mrf.mxu0  ;;  %v1398_v59 = vpop.f32.mrf.mxu1  ;;  %v1443_v20 = vadd.f32 %v1418_v60, %v1294_v15 }
 0x64b   :  { %v1441_v21 = vadd.f32 %v1378_v17, %v1254_v16  ;;  %v1442_v27 = vadd.f32 %v1398_v59, %v1274_v19 }
 0x651   :  { %v1438_v61 = vpop.f32.mrf.mxu3 }
 0x652   :  { %v1507_v62 = vpop.f32.mrf.mxu0  ;;  %v1527_v63 = vpop.f32.mrf.mxu1  ;;  %v1444_v26 = vadd.f32 %v1438_v61, %v1314_v18 }
 0x653   :  { %v1570_v29 = vadd.f32 %v1507_v62, %v1441_v21  ;;  %v1571_v31 = vadd.f32 %v1527_v63, %v1442_v27 }
 0x659   :  { %v1547_v0 = vpop.f32.mrf.mxu2  ;;  %v1567_v1 = vpop.f32.mrf.mxu3 }
 0x65a   :  { %v1596_v2 = vpop.f32.mrf.mxu0  ;;  %v1616_v3 = vpop.f32.mrf.mxu1  ;;  %v1572_v28 = vadd.f32 %v1547_v0, %v1443_v20  ;;  %v1573_v12 = vadd.f32 %v1567_v1, %v1444_v26 }
 0x65b   :  { %v1659_v24 = vadd.f32 %v1596_v2, %v1570_v29  ;;  %v1660_v52 = vadd.f32 %v1616_v3, %v1571_v31 }
 0x661   :  { %v1636_v4 = vpop.f32.mrf.mxu2  ;;  %v1656_v44 = vpop.f32.mrf.mxu3 }
 0x662   :  { %v1725_v5 = vpop.f32.mrf.mxu0  ;;  %v1745_v6 = vpop.f32.mrf.mxu1  ;;  %v1661_v22 = vadd.f32 %v1636_v4, %v1572_v28  ;;  %v1662_v33 = vadd.f32 %v1656_v44, %v1573_v12 }
 0x663   :  { %v1788_v34 = vadd.f32 %v1725_v5, %v1659_v24  ;;  %v1789_v37 = vadd.f32 %v1745_v6, %v1660_v52 }
 0x669   :  { %v1765_v45 = vpop.f32.mrf.mxu2  ;;  %v1785_v7 = vpop.f32.mrf.mxu3 }
 0x66a   :  { %v1854_v11 = vpop.f32.mrf.mxu0  ;;  %v1790_v25 = vadd.f32 %v1765_v45, %v1661_v22  ;;  %v1791_v35 = vadd.f32 %v1785_v7, %v1662_v33 }
 0x66b   :  { %v1874_v51 = vpop.f32.mrf.mxu1  ;;  %v1917_v42 = vadd.f32 %v1854_v11, %v1788_v34 }
 0x66c   :  { %v1918_v46 = vadd.f32 %v1874_v51, %v1789_v37 }
 0x671   :  { %v1894_v13 = vpop.f32.mrf.mxu2 }
 0x672   :  { %v1914_v14 = vpop.f32.mrf.mxu3  ;;  %v1983_v32 = vpop.f32.mrf.mxu0  ;;  %v1919_v36 = vadd.f32 %v1894_v13, %v1790_v25 }
 0x673   :  { %v2003_v8 = vpop.f32.mrf.mxu1  ;;  %v1920_v43 = vadd.f32 %v1914_v14, %v1791_v35  ;;  %v2046_v9 = vadd.f32 %v1983_v32, %v1917_v42 }
 0x674   :  { %v2047_v38 = vadd.f32 %v2003_v8, %v1918_v46 }
 0x67a   :  { %v2023_v30 = vpop.f32.mrf.mxu2  ;;  %v2043_v23 = vpop.f32.mrf.mxu3 }
 0x67b   :  { %v2048_v47 = vadd.f32 %v2023_v30, %v1919_v36  ;;  %v2049_v10 = vadd.f32 %v2043_v23, %v1920_v43 }
 0x682   :  { %v2152_v48 = vpop.f32.mrf.mxu2  ;;  %v2172_v39 = vpop.f32.mrf.mxu3 }
 0x683   :  { %v2177_v50 = vadd.f32 %v2152_v48, %v2048_v47  ;;  %v2112_v53 = vpop.f32.mrf.mxu0  ;;  %v2178_v54 = vadd.f32 %v2172_v39, %v2049_v10  ;;  %v2132_v55 = vpop.f32.mrf.mxu1 }
 0x684   :  { %v2175_v41 = vadd.f32 %v2112_v53, %v2046_v9  ;;  %v2176_v57 = vadd.f32 %v2132_v55, %v2047_v38 }
 0x685   :  { %v2187_v56 = vadd.f32 %v2183_v40, %v2177_v50  ;;  %v2188_v49 = vadd.f32 %v2183_v40, %v2178_v54 }
 0x686   :  { %v2185_v58 = vadd.f32 %v2183_v40, %v2175_v41  ;;  %v2186_v59 = vadd.f32 %v2183_v40, %v2176_v57 }
 0x687   :  { %v2191_v17 = vmax.f32 %v2187_v56, 0.0  ;;  %v2192_v60 = vmax.f32 %v2188_v49, 0.0 }
 0x688   :  { %v2189_v61 = vmax.f32 %v2185_v58, 0.0  ;;  %v2190_v62 = vmax.f32 %v2186_v59, 0.0 }
 0x689   :  { %2199 = vst [vmem:[%s3159_s23 + $0x30] sm:$0xff] %v2191_v17 }
 0x68a   :  { %2200 = vst [vmem:[%s3159_s23 + $0x38] sm:$0xff] %v2192_v60 }
 0x68b   :  { %2197 = vst [vmem:[%s3159_s23 + $0x20] sm:$0xff] %v2189_v61 }
 0x68c   :  { %2198 = vst [vmem:[%s3159_s23 + $0x28] sm:$0xff] %v2190_v62 }

</bundles_post_ra>
